<compile_context>
chip_gen: v5e
topology: v5e:2x2
jax: 0.10.0
libtpu: 0.0.40
codegen_flags: <defaults>
</compile_context>

<pallas_src>
import jax
import jax.numpy as jnp
from jax.experimental import pallas as pl
from jax.experimental.pallas import tpu as pltpu


HP = 128   # lane-padded hidden width: each LSTM gate block starts on a 128-lane boundary
OP = 128   # lane-padded logits width: lane-dense final store (real O sliced outside)


# --------------------------- fused LSTM + head kernel ------------------------
def fused_lstm_head_kernel(x_ref, wih_ref, whh_ref, b_ref, wh_ref, bh_ref, out_ref):
    BP = out_ref.shape[0]          # padded batch (multiple of 8 sublanes)
    TB = x_ref.shape[0]            # T * BP (time-major rows)
    T = TB // BP

    # Hoisted input projection for ALL timesteps: one [T*BP, E] x [E, 4*HP] matmul.
    gates_x = (jnp.dot(x_ref[...], wih_ref[...], preferred_element_type=jnp.float32)
               + b_ref[...])                               # [T*BP, 4*HP]

    whh = whh_ref[...]                                     # resident [HP, 4*HP]

    h = jnp.zeros((BP, HP), jnp.float32)
    c = jnp.zeros((BP, HP), jnp.float32)

    # Fully-unrolled recurrence (T is static and small) — only h @ W_hh per step.
    # Time-major layout => each step's slice is a contiguous, tile-aligned block.
    for t in range(T):
        g = (jnp.dot(h, whh, preferred_element_type=jnp.float32)
             + gates_x[t * BP:(t + 1) * BP, :])            # [BP, 4*HP]
        # Gate slices are whole 128-lane vregs (PyTorch gate order i, f, g, o).
        i = jax.nn.sigmoid(g[:, 0 * HP:1 * HP])
        f = jax.nn.sigmoid(g[:, 1 * HP:2 * HP])
        gg = jnp.tanh(g[:, 2 * HP:3 * HP])
        o = jax.nn.sigmoid(g[:, 3 * HP:4 * HP])
        c = f * c + i * gg
        h = o * jnp.tanh(c)
        # NOTE: zero-padded weight/bias lanes keep the padded parts of h/c exactly 0.

    # Fused FC head: fc2(fc1(h)) folded into a single matmul (dropout = identity,
    # no activation between fc1 and fc2 in the module's forward).
    out = jnp.dot(h, wh_ref[...], preferred_element_type=jnp.float32) + bh_ref[...]
    out_ref[...] = out.astype(out_ref.dtype)               # lane-dense [BP, OP] store


def rnn_over_bert_forward(sequence_output_bte, padded_params, out_dim):
    """sequence_output_bte: [B, T, E] (batch_first, like the PyTorch module)."""
    B, T, E = sequence_output_bte.shape
    BP = ((B + 7) // 8) * 8

    # Time-major + batch padded to a sublane multiple, flattened to 2-D outside the
    # kernel (cheap XLA ops on a tiny tensor; keeps all in-kernel slices aligned).
    x_tm = jnp.transpose(sequence_output_bte, (1, 0, 2))       # [T, B, E]
    x_tm = jnp.pad(x_tm, ((0, 0), (0, BP - B), (0, 0)))        # [T, BP, E]
    x2d = x_tm.reshape(T * BP, E)                              # row = t*BP + b

    logits_padded = pl.pallas_call(
        fused_lstm_head_kernel,
        out_shape=jax.ShapeDtypeStruct((BP, OP), jnp.float32),
        compiler_params=pltpu.CompilerParams(vmem_limit_bytes=64 * 1024 * 1024),
    )(x2d,
      padded_params["wih_t"], padded_params["whh_t"], padded_params["b_lstm"],
      padded_params["w_head"], padded_params["b_head"])
    return logits_padded[:B, :out_dim]


# --------------------------- parameter preparation ---------------------------
def _pad_gate_blocks(w, H):
    """[..., 4*H] -> [..., 4*HP]: place each gate block at a 128-lane boundary."""
    lead = w.shape[:-1]
    w4 = w.reshape(*lead, 4, H)
    w4p = jnp.pad(w4, [(0, 0)] * len(lead) + [(0, 0), (0, HP - H)])
    return w4p.reshape(*lead, 4 * HP)


def pad_params(params, H, O):
    wih_t = _pad_gate_blocks(params["wih_t"], H)                       # [E, 4*HP]
    whh_t = _pad_gate_blocks(params["whh_t"], H)                       # [H, 4*HP]
    whh_t = jnp.pad(whh_t, ((0, HP - H), (0, 0)))                      # [HP, 4*HP]
    b_lstm = _pad_gate_blocks(params["b_lstm"], H)                     # [1, 4*HP]
    # Fold fc1 -> fc2 once (mathematically identical at eval: dropout is identity
    # and there is no nonlinearity between the two Linears in forward()).
    w_head = params["w1_t"] @ params["w2_t"]                           # [H, O]
    b_head = params["b1"] @ params["w2_t"] + params["b2"]              # [1, O]
    w_head = jnp.pad(w_head, ((0, HP - H), (0, OP - O)))               # [HP, OP]
    b_head = jnp.pad(b_head, ((0, 0), (0, OP - O)))                    # [1, OP]
    return dict(wih_t=wih_t, whh_t=whh_t, b_lstm=b_lstm,
                w_head=w_head, b_head=b_head)


# ----------------------------- Pure-JAX reference ----------------------------
def reference_forward(sequence_output_bte, params):
    x = jnp.transpose(sequence_output_bte, (1, 0, 2))      # [T, B, E]
    T, B, E = x.shape
    H = params["whh_t"].shape[0]
    h = jnp.zeros((B, H), jnp.float32)
    c = jnp.zeros((B, H), jnp.float32)
    for t in range(T):
        g = x[t] @ params["wih_t"] + h @ params["whh_t"] + params["b_lstm"]
        i = jax.nn.sigmoid(g[:, :H])
        f = jax.nn.sigmoid(g[:, H:2 * H])
        gg = jnp.tanh(g[:, 2 * H:3 * H])
        o = jax.nn.sigmoid(g[:, 3 * H:])
        c = f * c + i * gg
        h = o * jnp.tanh(c)
    d1 = h @ params["w1_t"] + params["b1"]                  # fc1 (dropout = identity)
    return d1 @ params["w2_t"] + params["b2"]               # fc2


# ----------------------------- Driver -----------------------------------------
if __name__ == "__main__":
    # Module config: embedding_dim = bert hidden_size, nhid, n_layers=1,
    # bidirectional=False, output_dim -> small synthetic sizes.
    B, T, E, H, O = 2, 8, 32, 32, 4

    key = jax.random.PRNGKey(0)
    ks = jax.random.split(key, 8)

    # Synthetic stand-in for bert_outputs[0] (sequence_output), batch_first [B, T, E].
    sequence_output = jax.random.normal(ks[0], (B, T, E), jnp.float32)

    # Deterministic parameter init (PyTorch LSTM gate order i, f, g, o; weights
    # stored pre-transposed so the kernel does x @ W^T directly).
    scale = 0.1
    params = {
        "wih_t":  scale * jax.random.normal(ks[1], (E, 4 * H), jnp.float32),   # W_ih^T
        "whh_t":  scale * jax.random.normal(ks[2], (H, 4 * H), jnp.float32),   # W_hh^T
        "b_lstm": scale * jax.random.normal(ks[3], (1, 4 * H), jnp.float32),   # b_ih + b_hh
        "w1_t":   scale * jax.random.normal(ks[4], (H, H), jnp.float32),       # fc1.weight^T
        "b1":     scale * jax.random.normal(ks[5], (1, H), jnp.float32),
        "w2_t":   scale * jax.random.normal(ks[6], (H, O), jnp.float32),       # fc2.weight^T
        "b2":     scale * jax.random.normal(ks[7], (1, O), jnp.float32),
    }

    padded = pad_params(params, H, O)

    logits = rnn_over_bert_forward(sequence_output, padded, O)
    logits = jax.block_until_ready(logits)

    ref = reference_forward(sequence_output, params)
    assert logits.shape == (B, O)
    assert jnp.allclose(logits, ref, atol=2e-4, rtol=2e-4), "mismatch vs JAX reference"

    print("KERNEL_OK")
</pallas_src>

<mosaic_0001>
module attributes {stable_mosaic.version = 11 : i64} {
  func.func @fused_lstm_head_kernel(%arg0: memref<64x32xf32, #tpu.memory_space<vmem>>, %arg1: memref<32x512xf32, #tpu.memory_space<vmem>>, %arg2: memref<128x512xf32, #tpu.memory_space<vmem>>, %arg3: memref<1x512xf32, #tpu.memory_space<vmem>>, %arg4: memref<128x128xf32, #tpu.memory_space<vmem>>, %arg5: memref<1x128xf32, #tpu.memory_space<vmem>>, %arg6: memref<8x128xf32, #tpu.memory_space<vmem>>) attributes {dimension_semantics = [], scalar_prefetch = 0 : i64, scratch_operands = 0 : i64, tpu.core_type = #tpu.core_type<tc>} {
    %c0 = arith.constant 0 : index
    %c0_0 = arith.constant 0 : index
    %0 = vector.load %arg0[%c0, %c0_0] : memref<64x32xf32, #tpu.memory_space<vmem>>, vector<64x32xf32>
    %c0_1 = arith.constant 0 : index
    %c0_2 = arith.constant 0 : index
    %1 = vector.load %arg1[%c0_1, %c0_2] : memref<32x512xf32, #tpu.memory_space<vmem>>, vector<32x512xf32>
    %cst = arith.constant dense<0.000000e+00> : vector<64x512xf32>
    %2 = tpu.matmul %0, %1, %cst {dimension_numbers = #tpu.dot_dimension_numbers<[1], [0], [0], [1], [0, 0, 1, 1], [], []>} : vector<64x32xf32>, vector<32x512xf32>, vector<64x512xf32> -> vector<64x512xf32>
    %c0_3 = arith.constant 0 : index
    %c0_4 = arith.constant 0 : index
    %3 = vector.load %arg3[%c0_3, %c0_4] : memref<1x512xf32, #tpu.memory_space<vmem>>, vector<1x512xf32>
    %4 = vector.broadcast %3 : vector<1x512xf32> to vector<64x512xf32>
    %5 = arith.addf %2, %4 : vector<64x512xf32>
    %c0_5 = arith.constant 0 : index
    %c0_6 = arith.constant 0 : index
    %6 = vector.load %arg2[%c0_5, %c0_6] : memref<128x512xf32, #tpu.memory_space<vmem>>, vector<128x512xf32>
    %cst_7 = arith.constant 0.000000e+00 : f32
    %7 = vector.broadcast %cst_7 : f32 to vector<8x128xf32>
    %cst_8 = arith.constant 0.000000e+00 : f32
    %8 = vector.broadcast %cst_8 : f32 to vector<8x128xf32>
    %cst_9 = arith.constant dense<0.000000e+00> : vector<8x512xf32>
    %9 = tpu.matmul %7, %6, %cst_9 {dimension_numbers = #tpu.dot_dimension_numbers<[1], [0], [0], [1], [0, 0, 1, 1], [], []>} : vector<8x128xf32>, vector<128x512xf32>, vector<8x512xf32> -> vector<8x512xf32>
    %10 = vector.extract_strided_slice %5 {offsets = [0, 0], sizes = [8, 512], strides = [1, 1]} : vector<64x512xf32> to vector<8x512xf32>
    %11 = arith.addf %9, %10 : vector<8x512xf32>
    %12 = vector.extract_strided_slice %11 {offsets = [0, 0], sizes = [8, 128], strides = [1, 1]} : vector<8x512xf32> to vector<8x128xf32>
    %13 = arith.negf %12 : vector<8x128xf32>
    %14 = math.exp %13 : vector<8x128xf32>
    %cst_10 = arith.constant 1.000000e+00 : f32
    %15 = vector.broadcast %cst_10 : f32 to vector<8x128xf32>
    %16 = arith.addf %15, %14 : vector<8x128xf32>
    %17 = arith.divf %15, %16 : vector<8x128xf32>
    %18 = vector.extract_strided_slice %11 {offsets = [0, 128], sizes = [8, 128], strides = [1, 1]} : vector<8x512xf32> to vector<8x128xf32>
    %19 = arith.negf %18 : vector<8x128xf32>
    %20 = math.exp %19 : vector<8x128xf32>
    %cst_11 = arith.constant 1.000000e+00 : f32
    %21 = vector.broadcast %cst_11 : f32 to vector<8x128xf32>
    %22 = arith.addf %21, %20 : vector<8x128xf32>
    %23 = arith.divf %21, %22 : vector<8x128xf32>
    %24 = vector.extract_strided_slice %11 {offsets = [0, 256], sizes = [8, 128], strides = [1, 1]} : vector<8x512xf32> to vector<8x128xf32>
    %25 = math.tanh %24 : vector<8x128xf32>
    %26 = vector.extract_strided_slice %11 {offsets = [0, 384], sizes = [8, 128], strides = [1, 1]} : vector<8x512xf32> to vector<8x128xf32>
    %27 = arith.negf %26 : vector<8x128xf32>
    %28 = math.exp %27 : vector<8x128xf32>
    %cst_12 = arith.constant 1.000000e+00 : f32
    %29 = vector.broadcast %cst_12 : f32 to vector<8x128xf32>
    %30 = arith.addf %29, %28 : vector<8x128xf32>
    %31 = arith.divf %29, %30 : vector<8x128xf32>
    %32 = arith.mulf %23, %8 : vector<8x128xf32>
    %33 = arith.mulf %17, %25 : vector<8x128xf32>
    %34 = arith.addf %32, %33 : vector<8x128xf32>
    %35 = math.tanh %34 : vector<8x128xf32>
    %36 = arith.mulf %31, %35 : vector<8x128xf32>
    %cst_13 = arith.constant dense<0.000000e+00> : vector<8x512xf32>
    %37 = tpu.matmul %36, %6, %cst_13 {dimension_numbers = #tpu.dot_dimension_numbers<[1], [0], [0], [1], [0, 0, 1, 1], [], []>} : vector<8x128xf32>, vector<128x512xf32>, vector<8x512xf32> -> vector<8x512xf32>
    %38 = vector.extract_strided_slice %5 {offsets = [8, 0], sizes = [8, 512], strides = [1, 1]} : vector<64x512xf32> to vector<8x512xf32>
    %39 = arith.addf %37, %38 : vector<8x512xf32>
    %40 = vector.extract_strided_slice %39 {offsets = [0, 0], sizes = [8, 128], strides = [1, 1]} : vector<8x512xf32> to vector<8x128xf32>
    %41 = arith.negf %40 : vector<8x128xf32>
    %42 = math.exp %41 : vector<8x128xf32>
    %cst_14 = arith.constant 1.000000e+00 : f32
    %43 = vector.broadcast %cst_14 : f32 to vector<8x128xf32>
    %44 = arith.addf %43, %42 : vector<8x128xf32>
    %45 = arith.divf %43, %44 : vector<8x128xf32>
    %46 = vector.extract_strided_slice %39 {offsets = [0, 128], sizes = [8, 128], strides = [1, 1]} : vector<8x512xf32> to vector<8x128xf32>
    %47 = arith.negf %46 : vector<8x128xf32>
    %48 = math.exp %47 : vector<8x128xf32>
    %cst_15 = arith.constant 1.000000e+00 : f32
    %49 = vector.broadcast %cst_15 : f32 to vector<8x128xf32>
    %50 = arith.addf %49, %48 : vector<8x128xf32>
    %51 = arith.divf %49, %50 : vector<8x128xf32>
    %52 = vector.extract_strided_slice %39 {offsets = [0, 256], sizes = [8, 128], strides = [1, 1]} : vector<8x512xf32> to vector<8x128xf32>
    %53 = math.tanh %52 : vector<8x128xf32>
    %54 = vector.extract_strided_slice %39 {offsets = [0, 384], sizes = [8, 128], strides = [1, 1]} : vector<8x512xf32> to vector<8x128xf32>
    %55 = arith.negf %54 : vector<8x128xf32>
    %56 = math.exp %55 : vector<8x128xf32>
    %cst_16 = arith.constant 1.000000e+00 : f32
    %57 = vector.broadcast %cst_16 : f32 to vector<8x128xf32>
    %58 = arith.addf %57, %56 : vector<8x128xf32>
    %59 = arith.divf %57, %58 : vector<8x128xf32>
    %60 = arith.mulf %51, %34 : vector<8x128xf32>
    %61 = arith.mulf %45, %53 : vector<8x128xf32>
    %62 = arith.addf %60, %61 : vector<8x128xf32>
    %63 = math.tanh %62 : vector<8x128xf32>
    %64 = arith.mulf %59, %63 : vector<8x128xf32>
    %cst_17 = arith.constant dense<0.000000e+00> : vector<8x512xf32>
    %65 = tpu.matmul %64, %6, %cst_17 {dimension_numbers = #tpu.dot_dimension_numbers<[1], [0], [0], [1], [0, 0, 1, 1], [], []>} : vector<8x128xf32>, vector<128x512xf32>, vector<8x512xf32> -> vector<8x512xf32>
    %66 = vector.extract_strided_slice %5 {offsets = [16, 0], sizes = [8, 512], strides = [1, 1]} : vector<64x512xf32> to vector<8x512xf32>
    %67 = arith.addf %65, %66 : vector<8x512xf32>
    %68 = vector.extract_strided_slice %67 {offsets = [0, 0], sizes = [8, 128], strides = [1, 1]} : vector<8x512xf32> to vector<8x128xf32>
    %69 = arith.negf %68 : vector<8x128xf32>
    %70 = math.exp %69 : vector<8x128xf32>
    %cst_18 = arith.constant 1.000000e+00 : f32
    %71 = vector.broadcast %cst_18 : f32 to vector<8x128xf32>
    %72 = arith.addf %71, %70 : vector<8x128xf32>
    %73 = arith.divf %71, %72 : vector<8x128xf32>
    %74 = vector.extract_strided_slice %67 {offsets = [0, 128], sizes = [8, 128], strides = [1, 1]} : vector<8x512xf32> to vector<8x128xf32>
    %75 = arith.negf %74 : vector<8x128xf32>
    %76 = math.exp %75 : vector<8x128xf32>
    %cst_19 = arith.constant 1.000000e+00 : f32
    %77 = vector.broadcast %cst_19 : f32 to vector<8x128xf32>
    %78 = arith.addf %77, %76 : vector<8x128xf32>
    %79 = arith.divf %77, %78 : vector<8x128xf32>
    %80 = vector.extract_strided_slice %67 {offsets = [0, 256], sizes = [8, 128], strides = [1, 1]} : vector<8x512xf32> to vector<8x128xf32>
    %81 = math.tanh %80 : vector<8x128xf32>
    %82 = vector.extract_strided_slice %67 {offsets = [0, 384], sizes = [8, 128], strides = [1, 1]} : vector<8x512xf32> to vector<8x128xf32>
    %83 = arith.negf %82 : vector<8x128xf32>
    %84 = math.exp %83 : vector<8x128xf32>
    %cst_20 = arith.constant 1.000000e+00 : f32
    %85 = vector.broadcast %cst_20 : f32 to vector<8x128xf32>
    %86 = arith.addf %85, %84 : vector<8x128xf32>
    %87 = arith.divf %85, %86 : vector<8x128xf32>
    %88 = arith.mulf %79, %62 : vector<8x128xf32>
    %89 = arith.mulf %73, %81 : vector<8x128xf32>
    %90 = arith.addf %88, %89 : vector<8x128xf32>
    %91 = math.tanh %90 : vector<8x128xf32>
    %92 = arith.mulf %87, %91 : vector<8x128xf32>
    %cst_21 = arith.constant dense<0.000000e+00> : vector<8x512xf32>
    %93 = tpu.matmul %92, %6, %cst_21 {dimension_numbers = #tpu.dot_dimension_numbers<[1], [0], [0], [1], [0, 0, 1, 1], [], []>} : vector<8x128xf32>, vector<128x512xf32>, vector<8x512xf32> -> vector<8x512xf32>
    %94 = vector.extract_strided_slice %5 {offsets = [24, 0], sizes = [8, 512], strides = [1, 1]} : vector<64x512xf32> to vector<8x512xf32>
    %95 = arith.addf %93, %94 : vector<8x512xf32>
    %96 = vector.extract_strided_slice %95 {offsets = [0, 0], sizes = [8, 128], strides = [1, 1]} : vector<8x512xf32> to vector<8x128xf32>
    %97 = arith.negf %96 : vector<8x128xf32>
    %98 = math.exp %97 : vector<8x128xf32>
    %cst_22 = arith.constant 1.000000e+00 : f32
    %99 = vector.broadcast %cst_22 : f32 to vector<8x128xf32>
    %100 = arith.addf %99, %98 : vector<8x128xf32>
    %101 = arith.divf %99, %100 : vector<8x128xf32>
    %102 = vector.extract_strided_slice %95 {offsets = [0, 128], sizes = [8, 128], strides = [1, 1]} : vector<8x512xf32> to vector<8x128xf32>
    %103 = arith.negf %102 : vector<8x128xf32>
    %104 = math.exp %103 : vector<8x128xf32>
    %cst_23 = arith.constant 1.000000e+00 : f32
    %105 = vector.broadcast %cst_23 : f32 to vector<8x128xf32>
    %106 = arith.addf %105, %104 : vector<8x128xf32>
    %107 = arith.divf %105, %106 : vector<8x128xf32>
    %108 = vector.extract_strided_slice %95 {offsets = [0, 256], sizes = [8, 128], strides = [1, 1]} : vector<8x512xf32> to vector<8x128xf32>
    %109 = math.tanh %108 : vector<8x128xf32>
    %110 = vector.extract_strided_slice %95 {offsets = [0, 384], sizes = [8, 128], strides = [1, 1]} : vector<8x512xf32> to vector<8x128xf32>
    %111 = arith.negf %110 : vector<8x128xf32>
    %112 = math.exp %111 : vector<8x128xf32>
    %cst_24 = arith.constant 1.000000e+00 : f32
    %113 = vector.broadcast %cst_24 : f32 to vector<8x128xf32>
    %114 = arith.addf %113, %112 : vector<8x128xf32>
    %115 = arith.divf %113, %114 : vector<8x128xf32>
    %116 = arith.mulf %107, %90 : vector<8x128xf32>
    %117 = arith.mulf %101, %109 : vector<8x128xf32>
    %118 = arith.addf %116, %117 : vector<8x128xf32>
    %119 = math.tanh %118 : vector<8x128xf32>
    %120 = arith.mulf %115, %119 : vector<8x128xf32>
    %cst_25 = arith.constant dense<0.000000e+00> : vector<8x512xf32>
    %121 = tpu.matmul %120, %6, %cst_25 {dimension_numbers = #tpu.dot_dimension_numbers<[1], [0], [0], [1], [0, 0, 1, 1], [], []>} : vector<8x128xf32>, vector<128x512xf32>, vector<8x512xf32> -> vector<8x512xf32>
    %122 = vector.extract_strided_slice %5 {offsets = [32, 0], sizes = [8, 512], strides = [1, 1]} : vector<64x512xf32> to vector<8x512xf32>
    %123 = arith.addf %121, %122 : vector<8x512xf32>
    %124 = vector.extract_strided_slice %123 {offsets = [0, 0], sizes = [8, 128], strides = [1, 1]} : vector<8x512xf32> to vector<8x128xf32>
    %125 = arith.negf %124 : vector<8x128xf32>
    %126 = math.exp %125 : vector<8x128xf32>
    %cst_26 = arith.constant 1.000000e+00 : f32
    %127 = vector.broadcast %cst_26 : f32 to vector<8x128xf32>
    %128 = arith.addf %127, %126 : vector<8x128xf32>
    %129 = arith.divf %127, %128 : vector<8x128xf32>
    %130 = vector.extract_strided_slice %123 {offsets = [0, 128], sizes = [8, 128], strides = [1, 1]} : vector<8x512xf32> to vector<8x128xf32>
    %131 = arith.negf %130 : vector<8x128xf32>
    %132 = math.exp %131 : vector<8x128xf32>
    %cst_27 = arith.constant 1.000000e+00 : f32
    %133 = vector.broadcast %cst_27 : f32 to vector<8x128xf32>
    %134 = arith.addf %133, %132 : vector<8x128xf32>
    %135 = arith.divf %133, %134 : vector<8x128xf32>
    %136 = vector.extract_strided_slice %123 {offsets = [0, 256], sizes = [8, 128], strides = [1, 1]} : vector<8x512xf32> to vector<8x128xf32>
    %137 = math.tanh %136 : vector<8x128xf32>
    %138 = vector.extract_strided_slice %123 {offsets = [0, 384], sizes = [8, 128], strides = [1, 1]} : vector<8x512xf32> to vector<8x128xf32>
    %139 = arith.negf %138 : vector<8x128xf32>
    %140 = math.exp %139 : vector<8x128xf32>
    %cst_28 = arith.constant 1.000000e+00 : f32
    %141 = vector.broadcast %cst_28 : f32 to vector<8x128xf32>
    %142 = arith.addf %141, %140 : vector<8x128xf32>
    %143 = arith.divf %141, %142 : vector<8x128xf32>
    %144 = arith.mulf %135, %118 : vector<8x128xf32>
    %145 = arith.mulf %129, %137 : vector<8x128xf32>
    %146 = arith.addf %144, %145 : vector<8x128xf32>
    %147 = math.tanh %146 : vector<8x128xf32>
    %148 = arith.mulf %143, %147 : vector<8x128xf32>
    %cst_29 = arith.constant dense<0.000000e+00> : vector<8x512xf32>
    %149 = tpu.matmul %148, %6, %cst_29 {dimension_numbers = #tpu.dot_dimension_numbers<[1], [0], [0], [1], [0, 0, 1, 1], [], []>} : vector<8x128xf32>, vector<128x512xf32>, vector<8x512xf32> -> vector<8x512xf32>
    %150 = vector.extract_strided_slice %5 {offsets = [40, 0], sizes = [8, 512], strides = [1, 1]} : vector<64x512xf32> to vector<8x512xf32>
    %151 = arith.addf %149, %150 : vector<8x512xf32>
    %152 = vector.extract_strided_slice %151 {offsets = [0, 0], sizes = [8, 128], strides = [1, 1]} : vector<8x512xf32> to vector<8x128xf32>
    %153 = arith.negf %152 : vector<8x128xf32>
    %154 = math.exp %153 : vector<8x128xf32>
    %cst_30 = arith.constant 1.000000e+00 : f32
    %155 = vector.broadcast %cst_30 : f32 to vector<8x128xf32>
    %156 = arith.addf %155, %154 : vector<8x128xf32>
    %157 = arith.divf %155, %156 : vector<8x128xf32>
    %158 = vector.extract_strided_slice %151 {offsets = [0, 128], sizes = [8, 128], strides = [1, 1]} : vector<8x512xf32> to vector<8x128xf32>
    %159 = arith.negf %158 : vector<8x128xf32>
    %160 = math.exp %159 : vector<8x128xf32>
    %cst_31 = arith.constant 1.000000e+00 : f32
    %161 = vector.broadcast %cst_31 : f32 to vector<8x128xf32>
    %162 = arith.addf %161, %160 : vector<8x128xf32>
    %163 = arith.divf %161, %162 : vector<8x128xf32>
    %164 = vector.extract_strided_slice %151 {offsets = [0, 256], sizes = [8, 128], strides = [1, 1]} : vector<8x512xf32> to vector<8x128xf32>
    %165 = math.tanh %164 : vector<8x128xf32>
    %166 = vector.extract_strided_slice %151 {offsets = [0, 384], sizes = [8, 128], strides = [1, 1]} : vector<8x512xf32> to vector<8x128xf32>
    %167 = arith.negf %166 : vector<8x128xf32>
    %168 = math.exp %167 : vector<8x128xf32>
    %cst_32 = arith.constant 1.000000e+00 : f32
    %169 = vector.broadcast %cst_32 : f32 to vector<8x128xf32>
    %170 = arith.addf %169, %168 : vector<8x128xf32>
    %171 = arith.divf %169, %170 : vector<8x128xf32>
    %172 = arith.mulf %163, %146 : vector<8x128xf32>
    %173 = arith.mulf %157, %165 : vector<8x128xf32>
    %174 = arith.addf %172, %173 : vector<8x128xf32>
    %175 = math.tanh %174 : vector<8x128xf32>
    %176 = arith.mulf %171, %175 : vector<8x128xf32>
    %cst_33 = arith.constant dense<0.000000e+00> : vector<8x512xf32>
    %177 = tpu.matmul %176, %6, %cst_33 {dimension_numbers = #tpu.dot_dimension_numbers<[1], [0], [0], [1], [0, 0, 1, 1], [], []>} : vector<8x128xf32>, vector<128x512xf32>, vector<8x512xf32> -> vector<8x512xf32>
    %178 = vector.extract_strided_slice %5 {offsets = [48, 0], sizes = [8, 512], strides = [1, 1]} : vector<64x512xf32> to vector<8x512xf32>
    %179 = arith.addf %177, %178 : vector<8x512xf32>
    %180 = vector.extract_strided_slice %179 {offsets = [0, 0], sizes = [8, 128], strides = [1, 1]} : vector<8x512xf32> to vector<8x128xf32>
    %181 = arith.negf %180 : vector<8x128xf32>
    %182 = math.exp %181 : vector<8x128xf32>
    %cst_34 = arith.constant 1.000000e+00 : f32
    %183 = vector.broadcast %cst_34 : f32 to vector<8x128xf32>
    %184 = arith.addf %183, %182 : vector<8x128xf32>
    %185 = arith.divf %183, %184 : vector<8x128xf32>
    %186 = vector.extract_strided_slice %179 {offsets = [0, 128], sizes = [8, 128], strides = [1, 1]} : vector<8x512xf32> to vector<8x128xf32>
    %187 = arith.negf %186 : vector<8x128xf32>
    %188 = math.exp %187 : vector<8x128xf32>
    %cst_35 = arith.constant 1.000000e+00 : f32
    %189 = vector.broadcast %cst_35 : f32 to vector<8x128xf32>
    %190 = arith.addf %189, %188 : vector<8x128xf32>
    %191 = arith.divf %189, %190 : vector<8x128xf32>
    %192 = vector.extract_strided_slice %179 {offsets = [0, 256], sizes = [8, 128], strides = [1, 1]} : vector<8x512xf32> to vector<8x128xf32>
    %193 = math.tanh %192 : vector<8x128xf32>
    %194 = vector.extract_strided_slice %179 {offsets = [0, 384], sizes = [8, 128], strides = [1, 1]} : vector<8x512xf32> to vector<8x128xf32>
    %195 = arith.negf %194 : vector<8x128xf32>
    %196 = math.exp %195 : vector<8x128xf32>
    %cst_36 = arith.constant 1.000000e+00 : f32
    %197 = vector.broadcast %cst_36 : f32 to vector<8x128xf32>
    %198 = arith.addf %197, %196 : vector<8x128xf32>
    %199 = arith.divf %197, %198 : vector<8x128xf32>
    %200 = arith.mulf %191, %174 : vector<8x128xf32>
    %201 = arith.mulf %185, %193 : vector<8x128xf32>
    %202 = arith.addf %200, %201 : vector<8x128xf32>
    %203 = math.tanh %202 : vector<8x128xf32>
    %204 = arith.mulf %199, %203 : vector<8x128xf32>
    %cst_37 = arith.constant dense<0.000000e+00> : vector<8x512xf32>
    %205 = tpu.matmul %204, %6, %cst_37 {dimension_numbers = #tpu.dot_dimension_numbers<[1], [0], [0], [1], [0, 0, 1, 1], [], []>} : vector<8x128xf32>, vector<128x512xf32>, vector<8x512xf32> -> vector<8x512xf32>
    %206 = vector.extract_strided_slice %5 {offsets = [56, 0], sizes = [8, 512], strides = [1, 1]} : vector<64x512xf32> to vector<8x512xf32>
    %207 = arith.addf %205, %206 : vector<8x512xf32>
    %208 = vector.extract_strided_slice %207 {offsets = [0, 0], sizes = [8, 128], strides = [1, 1]} : vector<8x512xf32> to vector<8x128xf32>
    %209 = arith.negf %208 : vector<8x128xf32>
    %210 = math.exp %209 : vector<8x128xf32>
    %cst_38 = arith.constant 1.000000e+00 : f32
    %211 = vector.broadcast %cst_38 : f32 to vector<8x128xf32>
    %212 = arith.addf %211, %210 : vector<8x128xf32>
    %213 = arith.divf %211, %212 : vector<8x128xf32>
    %214 = vector.extract_strided_slice %207 {offsets = [0, 128], sizes = [8, 128], strides = [1, 1]} : vector<8x512xf32> to vector<8x128xf32>
    %215 = arith.negf %214 : vector<8x128xf32>
    %216 = math.exp %215 : vector<8x128xf32>
    %cst_39 = arith.constant 1.000000e+00 : f32
    %217 = vector.broadcast %cst_39 : f32 to vector<8x128xf32>
    %218 = arith.addf %217, %216 : vector<8x128xf32>
    %219 = arith.divf %217, %218 : vector<8x128xf32>
    %220 = vector.extract_strided_slice %207 {offsets = [0, 256], sizes = [8, 128], strides = [1, 1]} : vector<8x512xf32> to vector<8x128xf32>
    %221 = math.tanh %220 : vector<8x128xf32>
    %222 = vector.extract_strided_slice %207 {offsets = [0, 384], sizes = [8, 128], strides = [1, 1]} : vector<8x512xf32> to vector<8x128xf32>
    %223 = arith.negf %222 : vector<8x128xf32>
    %224 = math.exp %223 : vector<8x128xf32>
    %cst_40 = arith.constant 1.000000e+00 : f32
    %225 = vector.broadcast %cst_40 : f32 to vector<8x128xf32>
    %226 = arith.addf %225, %224 : vector<8x128xf32>
    %227 = arith.divf %225, %226 : vector<8x128xf32>
    %228 = arith.mulf %219, %202 : vector<8x128xf32>
    %229 = arith.mulf %213, %221 : vector<8x128xf32>
    %230 = arith.addf %228, %229 : vector<8x128xf32>
    %231 = math.tanh %230 : vector<8x128xf32>
    %232 = arith.mulf %227, %231 : vector<8x128xf32>
    %c0_41 = arith.constant 0 : index
    %c0_42 = arith.constant 0 : index
    %233 = vector.load %arg4[%c0_41, %c0_42] : memref<128x128xf32, #tpu.memory_space<vmem>>, vector<128x128xf32>
    %cst_43 = arith.constant dense<0.000000e+00> : vector<8x128xf32>
    %234 = tpu.matmul %232, %233, %cst_43 {dimension_numbers = #tpu.dot_dimension_numbers<[1], [0], [0], [1], [0, 0, 1, 1], [], []>} : vector<8x128xf32>, vector<128x128xf32>, vector<8x128xf32> -> vector<8x128xf32>
    %c0_44 = arith.constant 0 : index
    %c0_45 = arith.constant 0 : index
    %235 = vector.load %arg5[%c0_44, %c0_45] : memref<1x128xf32, #tpu.memory_space<vmem>>, vector<1x128xf32>
    %236 = vector.broadcast %235 : vector<1x128xf32> to vector<8x128xf32>
    %237 = arith.addf %234, %236 : vector<8x128xf32>
    %c0_46 = arith.constant 0 : index
    %c0_47 = arith.constant 0 : index
    %238 = vector.load %arg6[%c0_46, %c0_47] : memref<8x128xf32, #tpu.memory_space<vmem>>, vector<8x128xf32>
    tpu.vector_store %arg6[%c0_46, %c0_47], %237 {strides = array<i32>} : memref<8x128xf32, #tpu.memory_space<vmem>>, vector<8x128xf32>,
    return
  }
}

</mosaic_0001>

<bundles_post_ra>
// kernel: tpu_custom_call.1
= control target key start
LH: loop header
LB: loop body
LE: loop exit
PB: predicated region body
PF: predicated region fallthrough
CT: control target
= control target key end

     0   :  { %11 = vsyncpa [#allocation3], 0  ;;  %s2969_s0 = inlined_call_operand.vmem [shape: f32[64,32], index: 0, kind: input, shape index: {}]   ;;  %s2970_s1 = inlined_call_operand.hbm [shape: f32[32,512], index: 1, kind: input, shape index: {}]   ;;  %s2971_s2 = inlined_call_operand.hbm [shape: f32[128,512], index: 2, kind: input, shape index: {}]   ;;  %s2972_s3 = inlined_call_operand.vmem [shape: f32[1,512], index: 3, kind: input, shape index: {}]   ;;  %s2973_s4 = inlined_call_operand.hbm [shape: f32[128,128], index: 4, kind: input, shape index: {}]   ;;  %s2974_s5 = inlined_call_operand.vmem [shape: f32[1,128], index: 5, kind: input, shape index: {}]   ;;  %s2975_s6 = inlined_call_operand.hbm [shape: f32[8,128], index: 6, kind: output, shape index: {}]  }
   0x1   :  { %12 = vsyncpa [#allocation6], 0 }
   0x2   :  { %13 = vsyncpa [#allocation4], 0  ;;  %s33_s23 = sshll.u32 %s2971_s2, 4  ;;  %s1933_s24 = smov [#allocation5]   ;;  %s34_s23 = int_to_ptr.hbm [resolvable:$true] %s33_s23 }
   0x3   :  { %s35_s25 = sshll.u32 %s1933_s24, 4  ;;  %s20_s28 = sshll.u32 %s2970_s1, 4  ;;  %s36_s25 = int_to_ptr.vmem [resolvable:$true] %s35_s25  ;;  %s21_s28 = int_to_ptr.hbm [resolvable:$true] %s20_s28 }
   0x4   :  { %s1934_s29 = smov 512   ;;  %s1935_s30 = smov 32  }
   0x5   :  { %41 = dma.hbm_to_vmem [thread:$0]  %s34_s23, 8192, %s36_s25, [#allocation6], %s1934_s29, %s1934_s29, %s1935_s30  }
   0x6   :  { %s1936_s7 = smov [#allocation2]   ;;  %s48_s11 = sshll.u32 %s2973_s4, 4  ;;  %s49_s11 = int_to_ptr.hbm [resolvable:$true] %s48_s11 }
   0x7   :  { %s22_s8 = sshll.u32 %s1936_s7, 4  ;;  %s1937_s2 = smov [#allocation7]   ;;  %s23_s8 = int_to_ptr.vmem [resolvable:$true] %s22_s8 }
   0x8   :  { %28 = dma.hbm_to_vmem [thread:$0]  %s21_s28, 2048, %s23_s8, [#allocation3], %s1934_s29, %s1934_s29, %s1935_s30  }
   0x9   :  { %s50_s12 = sshll.u32 %s1937_s2, 4  ;;  %s1938_s13 = smov 128   ;;  %s51_s12 = int_to_ptr.vmem [resolvable:$true] %s50_s12 }
   0xa   :  { %s1939_s14 = smov 8  }
   0xb   :  { %56 = dma.hbm_to_vmem [thread:$0]  %s49_s11, 2048, %s51_s12, [#allocation6], %s1938_s13, %s1938_s13, %s1939_s14  }
   0xc   :  { %1927 = dma.done.wait [#allocation3], 2048  }
   0xd   :  { %1928 = vsyncadd [#allocation3], 4294965248 }
   0xe   :  { %1929 = dma.done.wait [#allocation6], 10240  }
   0xf   :  { %1930 = vsyncadd [#allocation6], 4294957056  ;;  %v91_v0 = vld [vmem:[#allocation2 + $0x60] sm:$0xff]  ;;  %vm105_vm0 = vcmask 261120   ;;  %v1992_v5 = vld [vmem:[%s2969_s0 + $0x28] sm:$0xff]  ;;  %s1941_s7 = smov [#allocation8]  }
  0x10   :  { %v87_v1 = vld [vmem:[#allocation2 + $0x40] sm:$0xff]  ;;  %142 = vmatpush.msra.mxu0 %v91_v0  ;;  %1617 = vmatpush.msra.mxu1 %v91_v0  ;;  %v1997_v6 = vld [vmem:[%s2969_s0 + $0x30] sm:$0xff]  ;;  %v2002_v7 = vld [vmem:[%s2969_s0 + $0x38] sm:$0xff]  ;;  %s1548_s8 = sshll.u32 %s1941_s7, 4  ;;  %s1550_s11 = sshll.u32 %s2975_s6, 4  ;;  %s1549_s8 = int_to_ptr.vmem [resolvable:$true] %s1548_s8  ;;  %s1551_s11 = int_to_ptr.hbm [resolvable:$true] %s1550_s11 }
  0x11   :  { %1618 = vmatpush.msra.mxu2 %v91_v0  ;;  %1619 = vmatpush.msra.mxu3 %v91_v0  ;;  %v83_v2 = vld [vmem:[#allocation2 + $0x20] sm:$0xff]  ;;  %v92_v8 = vld [vmem:[#allocation2 + $0x68] sm:$0xff]  ;;  %v93_v9 = vld [vmem:[#allocation2 + $0x70] sm:$0xff] }
  0x12   :  { %143 = vmatpush.msra.mxu0 %v87_v1  ;;  %1620 = vmatpush.msra.mxu1 %v87_v1  ;;  %v79_v3 = vld [vmem:[#allocation2] sm:$0xff]  ;;  %v94_v10 = vld [vmem:[#allocation2 + $0x78] sm:$0xff]  ;;  %v88_v12 = vld [vmem:[#allocation2 + $0x48] sm:$0xff] }
  0x13   :  { %1621 = vmatpush.msra.mxu2 %v87_v1  ;;  %1622 = vmatpush.msra.mxu3 %v87_v1  ;;  %v71_v4 = vld [vmem:[%s2969_s0] sm:$0xff]  ;;  %v89_v13 = vld [vmem:[#allocation2 + $0x50] sm:$0xff]  ;;  %v90_v14 = vld [vmem:[#allocation2 + $0x58] sm:$0xff] }
  0x14   :  { %144 = vmatpush.msra.mxu0 %v83_v2  ;;  %1623 = vmatpush.msra.mxu1 %v83_v2  ;;  %v2007_v11 = vld [vmem:[#allocation5 + $0x1e0] sm:$0xff]  ;;  %v84_v16 = vld [vmem:[#allocation2 + $0x28] sm:$0xff]  ;;  %v85_v17 = vld [vmem:[#allocation2 + $0x30] sm:$0xff] }
  0x15   :  { %1624 = vmatpush.msra.mxu2 %v83_v2  ;;  %1625 = vmatpush.msra.mxu3 %v83_v2  ;;  %3076 = vst [vmem:[#allocation12_spill] sm:$0xff] %v2007_v11  ;;  %v2013_v15 = vld [vmem:[#allocation5 + $0x1c0] sm:$0xff]  ;;  %v86_v18 = vld [vmem:[#allocation2 + $0x38] sm:$0xff]  ;;  %v80_v20 = vld [vmem:[#allocation2 + $0x8] sm:$0xff] }
  0x16   :  { %145 = vmatpush.msra.mxu0 %v79_v3  ;;  %1626 = vmatpush.msra.mxu1 %v79_v3  ;;  %v2016_v19 = vld [vmem:[#allocation5 + $0x1a0] sm:$0xff]  ;;  %v81_v21 = vld [vmem:[#allocation2 + $0x10] sm:$0xff]  ;;  %v82_v22 = vld [vmem:[#allocation2 + $0x18] sm:$0xff] }
  0x17   :  { %1627 = vmatpush.msra.mxu2 %v79_v3  ;;  %1628 = vmatpush.msra.mxu3 %v79_v3  ;;  %v72_v23 = vld [vmem:[%s2969_s0 + $0x8] sm:$0xff]  ;;  %v2026_v25 = vld [vmem:[#allocation5 + $0x1f8] sm:$0xff]  ;;  %v2028_v26 = vld [vmem:[#allocation5 + $0x180] sm:$0xff] }
  0x18   :  { %1561 = vmatmul.msk.f32.vlgmr.msra.gmra.mxu0 %vm105_vm0, %v71_v4  ;;  %1566 = vmatmul.msk.f32.vlgmr.msra.gmra.mxu1 %vm105_vm0, %v1992_v5  ;;  %v2023_v24 = vld [vmem:[#allocation5 + $0x1e8] sm:$0xff]  ;;  %v2034_v28 = vld [vmem:[#allocation5 + $0x1f0] sm:$0xff]  ;;  %v2038_v29 = vld [vmem:[#allocation5 + $0x160] sm:$0xff] }
  0x19   :  { %1567 = vmatmul.msk.f32.vlgmr.msra.gmra.mxu2 %vm105_vm0, %v1997_v6  ;;  %1568 = vmatmul.msk.f32.vlgmr.msra.gmra.mxu3 %vm105_vm0, %v2002_v7  ;;  %v2032_v27 = vld [vmem:[#allocation5 + $0x1c8] sm:$0xff]  ;;  %v2040_v30 = vld [vmem:[#allocation5 + $0x1d8] sm:$0xff]  ;;  %v2046_v32 = vld [vmem:[#allocation5 + $0x1d0] sm:$0xff] }
  0x1a   :  { %183 = vmatpush.msrb.mxu1 %v92_v8  ;;  %224 = vmatpush.msrb.mxu2 %v93_v9  ;;  %v2044_v31 = vld [vmem:[#allocation5 + $0x1a8] sm:$0xff]  ;;  %v2049_v33 = vld [vmem:[#allocation5 + $0x140] sm:$0xff]  ;;  %v2051_v34 = vld [vmem:[#allocation5 + $0x1b8] sm:$0xff] }
  0x1b   :  { %265 = vmatpush.msrb.mxu3 %v94_v10  ;;  %358 = vmatpush.msrb.mxu0 %v2007_v11  ;;  %v73_v35 = vld [vmem:[%s2969_s0 + $0x10] sm:$0xff]  ;;  %v2059_v36 = vld [vmem:[#allocation5 + $0x188] sm:$0xff]  ;;  %v2064_v37 = vld [vmem:[#allocation5 + $0x120] sm:$0xff] }
  0x1c   :  { %184 = vmatpush.msrb.mxu1 %v88_v12  ;;  %225 = vmatpush.msrb.mxu2 %v89_v13  ;;  %v2069_v38 = vld [vmem:[#allocation5 + $0x168] sm:$0xff]  ;;  %v2071_v39 = vld [vmem:[#allocation5 + $0x198] sm:$0xff]  ;;  %v2075_v40 = vld [vmem:[#allocation5 + $0x100] sm:$0xff] }
  0x1d   :  { %266 = vmatpush.msrb.mxu3 %v90_v14  ;;  %359 = vmatpush.msrb.mxu0 %v2013_v15  ;;  %v2077_v41 = vld [vmem:[#allocation5 + $0x1b0] sm:$0xff]  ;;  %v2081_v42 = vld [vmem:[#allocation5 + $0x148] sm:$0xff]  ;;  %v2083_v43 = vld [vmem:[#allocation5 + $0x178] sm:$0xff] }
  0x1e   :  { %185 = vmatpush.msrb.mxu1 %v84_v16  ;;  %226 = vmatpush.msrb.mxu2 %v85_v17  ;;  %v2086_v44 = vld [vmem:[#allocation5 + $0xe0] sm:$0xff]  ;;  %v2089_v45 = vld [vmem:[#allocation5 + $0x190] sm:$0xff]  ;;  %v2093_v46 = vld [vmem:[#allocation5 + $0x128] sm:$0xff] }
  0x1f   :  { %267 = vmatpush.msrb.mxu3 %v86_v18  ;;  %360 = vmatpush.msrb.mxu0 %v2016_v19  ;;  %v2095_v47 = vld [vmem:[#allocation5 + $0x158] sm:$0xff]  ;;  %v2102_v49 = vld [vmem:[#allocation5 + $0x170] sm:$0xff]  ;;  %v2106_v50 = vld [vmem:[#allocation5 + $0xc0] sm:$0xff] }
  0x20   :  { %186 = vmatpush.msrb.mxu1 %v80_v20  ;;  %227 = vmatpush.msrb.mxu2 %v81_v21  ;;  %v74_v48 = vld [vmem:[%s2969_s0 + $0x18] sm:$0xff]  ;;  %v2111_v51 = vld [vmem:[#allocation5 + $0x108] sm:$0xff]  ;;  %v2118_v53 = vld [vmem:[#allocation5 + $0xa0] sm:$0xff]  ;;  %v2978_v21 = vmov 0.0  }
  0x21   :  { %268 = vmatpush.msrb.mxu3 %v82_v22  ;;  %1562 = vmatmul.msk.f32.gmra.mxu0 %vm105_vm0, %v72_v23  ;;  %v2113_v52 = vld [vmem:[#allocation5 + $0x138] sm:$0xff]  ;;  %3077 = vst [vmem:[#allocation13_spill] sm:$0xff] %v2118_v53  ;;  %v2120_v54 = vld [vmem:[#allocation5 + $0x150] sm:$0xff]  ;;  %v2124_v55 = vld [vmem:[#allocation5 + $0xe8] sm:$0xff] }
  0x22   :  { %1569 = vmatmul.msk.f32.vlgmr.msrb.gmra.mxu1 %vm105_vm0, %v71_v4  ;;  %1577 = vmatmul.msk.f32.vlgmr.msrb.gmra.mxu2 %vm105_vm0, %v71_v4  ;;  %v2126_v56 = vld [vmem:[#allocation5 + $0x118] sm:$0xff]  ;;  %v2128_v57 = vld [vmem:[#allocation5 + $0x80] sm:$0xff]  ;;  %v2132_v58 = vld [vmem:[#allocation5 + $0x130] sm:$0xff] }
  0x23   :  { %1585 = vmatmul.msk.f32.vlgmr.msrb.gmra.mxu3 %vm105_vm0, %v71_v4  ;;  %378 = vmatpush.msra.mxu1 %v2023_v24  ;;  %3078 = vst [vmem:[#allocation14_spill] sm:$0xff] %v2128_v57  ;;  %v2136_v59 = vld [vmem:[#allocation5 + $0xc8] sm:$0xff]  ;;  %v2138_v60 = vld [vmem:[#allocation5 + $0xf8] sm:$0xff]  ;;  %v75_v61 = vld [vmem:[%s2969_s0 + $0x20] sm:$0xff] }
  0x24   :  { %418 = vmatpush.msra.mxu3 %v2026_v25  ;;  %361 = vmatpush.msrb.mxu0 %v2028_v26  ;;  %v2145_v62 = vld [vmem:[#allocation5 + $0x110] sm:$0xff]  ;;  %v2149_v63 = vld [vmem:[#allocation5 + $0x60] sm:$0xff]  ;;  %v2154_v0 = vld [vmem:[#allocation5 + $0xa8] sm:$0xff] }
  0x25   :  { %379 = vmatpush.msra.mxu1 %v2032_v27  ;;  %398 = vmatpush.msra.mxu2 %v2034_v28  ;;  %3079 = vst [vmem:[#allocation15_spill] sm:$0xff] %v2149_v63  ;;  %v2156_v1 = vld [vmem:[#allocation5 + $0xd8] sm:$0xff]  ;;  %v2161_v2 = vld [vmem:[#allocation5 + $0x40] sm:$0xff]  ;;  %v2163_v3 = vld [vmem:[#allocation5 + $0xf0] sm:$0xff] }
  0x26   :  { %362 = vmatpush.msrb.mxu0 %v2038_v29  ;;  %419 = vmatpush.msra.mxu3 %v2040_v30  ;;  %3080 = vst [vmem:[#allocation16_spill] sm:$0xff] %v2154_v0  ;;  %v2167_v4 = vld [vmem:[#allocation5 + $0x88] sm:$0xff]  ;;  %v2169_v8 = vld [vmem:[#allocation5 + $0xb8] sm:$0xff]  ;;  %v2171_v9 = vld [vmem:[#allocation5 + $0x20] sm:$0xff] }
  0x27   :  { %380 = vmatpush.msra.mxu1 %v2044_v31  ;;  %399 = vmatpush.msra.mxu2 %v2046_v32  ;;  %3081 = vst [vmem:[#allocation17_spill] sm:$0xff] %v2156_v1  ;;  %v2175_v10 = vld [vmem:[#allocation5 + $0xd0] sm:$0xff]  ;;  %v2179_v12 = vld [vmem:[#allocation5 + $0x68] sm:$0xff]  ;;  %v2181_v13 = vld [vmem:[#allocation5 + $0x98] sm:$0xff] }
  0x28   :  { %363 = vmatpush.msrb.mxu0 %v2049_v33  ;;  %420 = vmatpush.msra.mxu3 %v2051_v34  ;;  %3082 = vst [vmem:[#allocation18_spill] sm:$0xff] %v2161_v2  ;;  %v2183_v14 = vld [vmem:[#allocation5] sm:$0xff]  ;;  %v2187_v16 = vld [vmem:[#allocation5 + $0xb0] sm:$0xff]  ;;  %v2194_v17 = vld [vmem:[#allocation5 + $0x48] sm:$0xff] }
  0x29   :  { %1563 = vmatmul.msk.f32.gmra.mxu0 %vm105_vm0, %v73_v35  ;;  %381 = vmatpush.msra.mxu1 %v2059_v36  ;;  %3083 = vst [vmem:[#allocation19_spill] sm:$0xff] %v2167_v4  ;;  %v2197_v18 = vld [vmem:[#allocation5 + $0x78] sm:$0xff]  ;;  %v2201_v20 = vld [vmem:[#allocation5 + $0x90] sm:$0xff]  ;;  %v2205_v22 = vld [vmem:[#allocation5 + $0x28] sm:$0xff] }
  0x2a   :  { %1570 = vmatmul.msk.f32.gmra.mxu1 %vm105_vm0, %v72_v23  ;;  %1578 = vmatmul.msk.f32.gmra.mxu2 %vm105_vm0, %v72_v23  ;;  %3084 = vst [vmem:[#allocation20_spill] sm:$0xff] %v2169_v8 }
  0x2b   :  { %1586 = vmatmul.msk.f32.gmra.mxu3 %vm105_vm0, %v72_v23  ;;  %364 = vmatpush.msrb.mxu0 %v2064_v37  ;;  %3085 = vst [vmem:[#allocation21_spill] sm:$0xff] %v2171_v9  ;;  %v2207_v23 = vld [vmem:[#allocation5 + $0x58] sm:$0xff] }
  0x2c   :  { %382 = vmatpush.msra.mxu1 %v2069_v38  ;;  %421 = vmatpush.msra.mxu3 %v2071_v39  ;;  %3086 = vst [vmem:[#allocation22_spill] sm:$0xff] %v2175_v10 }
  0x2d   :  { %365 = vmatpush.msrb.mxu0 %v2075_v40  ;;  %400 = vmatpush.msra.mxu2 %v2077_v41  ;;  %3087 = vst [vmem:[#allocation23_spill] sm:$0xff] %v2179_v12 }
  0x2e   :  { %383 = vmatpush.msra.mxu1 %v2081_v42  ;;  %422 = vmatpush.msra.mxu3 %v2083_v43  ;;  %3088 = vst [vmem:[#allocation24_spill] sm:$0xff] %v2181_v13 }
  0x2f   :  { %366 = vmatpush.msrb.mxu0 %v2086_v44  ;;  %401 = vmatpush.msra.mxu2 %v2089_v45  ;;  %3089 = vst [vmem:[#allocation25_spill] sm:$0xff] %v2183_v14 }
  0x30   :  { %384 = vmatpush.msra.mxu1 %v2093_v46  ;;  %423 = vmatpush.msra.mxu3 %v2095_v47  ;;  %3090 = vst [vmem:[#allocation26_spill] sm:$0xff] %v2187_v16 }
  0x31   :  { %1564 = vmatmul.msk.f32.gmra.mxu0 %vm105_vm0, %v74_v48  ;;  %402 = vmatpush.msra.mxu2 %v2102_v49  ;;  %3091 = vst [vmem:[#allocation27_spill] sm:$0xff] %v2194_v17 }
  0x32   :  { %1571 = vmatmul.msk.f32.gmra.mxu1 %vm105_vm0, %v73_v35  ;;  %1579 = vmatmul.msk.f32.gmra.mxu2 %vm105_vm0, %v73_v35  ;;  %3092 = vst [vmem:[#allocation28_spill] sm:$0xff] %v2197_v18 }
  0x33   :  { %1587 = vmatmul.msk.f32.gmra.mxu3 %vm105_vm0, %v73_v35  ;;  %367 = vmatpush.msrb.mxu0 %v2106_v50  ;;  %3093 = vst [vmem:[#allocation29_spill] sm:$0xff] %v2201_v20  ;;  %v2211_v35 = vld [vmem:[#allocation5 + $0x70] sm:$0xff] }
  0x34   :  { %385 = vmatpush.msra.mxu1 %v2111_v51  ;;  %424 = vmatpush.msra.mxu3 %v2113_v52  ;;  %3094 = vst [vmem:[#allocation30_spill] sm:$0xff] %v2205_v22 }
  0x35   :  { %368 = vmatpush.msrb.mxu0 %v2118_v53  ;;  %403 = vmatpush.msra.mxu2 %v2120_v54  ;;  %3095 = vst [vmem:[#allocation31_spill] sm:$0xff] %v2207_v23 }
  0x36   :  { %386 = vmatpush.msra.mxu1 %v2124_v55  ;;  %425 = vmatpush.msra.mxu3 %v2126_v56  ;;  %3096 = vst [vmem:[#allocation32_spill] sm:$0xff] %v2211_v35 }
  0x37   :  { %369 = vmatpush.msrb.mxu0 %v2128_v57  ;;  %404 = vmatpush.msra.mxu2 %v2132_v58 }
  0x38   :  { %387 = vmatpush.msra.mxu1 %v2136_v59  ;;  %426 = vmatpush.msra.mxu3 %v2138_v60 }
  0x39   :  { %1565 = vmatmul.msk.f32.gmra.mxu0 %vm105_vm0, %v75_v61  ;;  %405 = vmatpush.msra.mxu2 %v2145_v62 }
  0x3a   :  { %1572 = vmatmul.msk.f32.gmra.mxu1 %vm105_vm0, %v74_v48  ;;  %1580 = vmatmul.msk.f32.gmra.mxu2 %vm105_vm0, %v74_v48 }
  0x3b   :  { %1588 = vmatmul.msk.f32.gmra.mxu3 %vm105_vm0, %v74_v48  ;;  %370 = vmatpush.msrb.mxu0 %v2149_v63  ;;  %v2214_v48 = vld [vmem:[#allocation5 + $0x8] sm:$0xff] }
  0x3c   :  { %388 = vmatpush.msra.mxu1 %v2154_v0  ;;  %427 = vmatpush.msra.mxu3 %v2156_v1  ;;  %3097 = vst [vmem:[#allocation33_spill] sm:$0xff] %v2214_v48 }
  0x3d   :  { %371 = vmatpush.msrb.mxu0 %v2161_v2  ;;  %406 = vmatpush.msra.mxu2 %v2163_v3 }
  0x3e   :  { %389 = vmatpush.msra.mxu1 %v2167_v4  ;;  %428 = vmatpush.msra.mxu3 %v2169_v8 }
  0x3f   :  { %372 = vmatpush.msrb.mxu0 %v2171_v9  ;;  %407 = vmatpush.msra.mxu2 %v2175_v10  ;;  %v2230_v9 = vld [vmem:[#allocation5 + $0x18] sm:$0xff] }
  0x40   :  { %390 = vmatpush.msra.mxu1 %v2179_v12  ;;  %429 = vmatpush.msra.mxu3 %v2181_v13  ;;  %3101 = vst [vmem:[#allocation37_spill] sm:$0xff] %v2230_v9 }
  0x41   :  { %373 = vmatpush.msrb.mxu0 %v2183_v14  ;;  %408 = vmatpush.msra.mxu2 %v2187_v16  ;;  %v2216_v14 = vld [vmem:[#allocation5 + $0x38] sm:$0xff] }
  0x42   :  { %1573 = vmatmul.msk.f32.gmra.mxu1 %vm105_vm0, %v75_v61  ;;  %1581 = vmatmul.msk.f32.gmra.mxu2 %vm105_vm0, %v75_v61  ;;  %3098 = vst [vmem:[#allocation34_spill] sm:$0xff] %v2216_v14 }
  0x43   :  { %1589 = vmatmul.msk.f32.gmra.mxu3 %vm105_vm0, %v75_v61  ;;  %374 = vmatmul.f32.vlgmr.msrb.gmra.mxu0 %v2978_v21  ;;  %v2221_v61 = vld [vmem:[#allocation5 + $0x50] sm:$0xff] }
  0x44   :  { %391 = vmatpush.msra.mxu1 %v2194_v17  ;;  %430 = vmatpush.msra.mxu3 %v2197_v18  ;;  %3099 = vst [vmem:[#allocation35_spill] sm:$0xff] %v2221_v61  ;;  %v2226_v21 = vld [vmem:[#allocation5 + $0x30] sm:$0xff] }
  0x45   :  { %409 = vmatpush.msra.mxu2 %v2201_v20  ;;  %501 = vmatpush.msra.mxu0 %v2007_v11  ;;  %3100 = vst [vmem:[#allocation36_spill] sm:$0xff] %v2226_v21  ;;  %v2237_v11 = vld [vmem:[#allocation5 + $0x10] sm:$0xff] }
  0x46   :  { %392 = vmatpush.msra.mxu1 %v2205_v22  ;;  %431 = vmatpush.msra.mxu3 %v2207_v23  ;;  %3102 = vst [vmem:[#allocation38_spill] sm:$0xff] %v2237_v11 }
  0x47   :  { %410 = vmatpush.msra.mxu2 %v2211_v35  ;;  %502 = vmatpush.msra.mxu0 %v2013_v15 }
  0x48   :  { %393 = vmatpush.msra.mxu1 %v2214_v48  ;;  %432 = vmatpush.msra.mxu3 %v2216_v14 }
  0x49   :  { %411 = vmatpush.msra.mxu2 %v2221_v61  ;;  %503 = vmatpush.msra.mxu0 %v2016_v19 }
  0x4a   :  { %521 = vmatpush.msrb.mxu1 %v2023_v24  ;;  %1582 = vmatmul.msk.f32.gmra.mxu2 %vm105_vm0, %v1992_v5 }
  0x4b   :  { %1574 = vmatmul.msk.f32.gmra.mxu1 %vm105_vm0, %v1992_v5  ;;  %1590 = vmatmul.msk.f32.gmra.mxu3 %vm105_vm0, %v1992_v5  ;;  %v3103_v5 = vmov 0.0  }
  0x4c   :  { %412 = vmatpush.msra.mxu2 %v2226_v21  ;;  %433 = vmatpush.msra.mxu3 %v2230_v9 }
  0x4d   :  { %522 = vmatpush.msrb.mxu1 %v2032_v27  ;;  %504 = vmatpush.msra.mxu0 %v2028_v26 }
  0x4e   :  { %413 = vmatpush.msra.mxu2 %v2237_v11  ;;  %561 = vmatpush.msrb.mxu3 %v2026_v25 }
  0x4f   :  { %523 = vmatpush.msrb.mxu1 %v2044_v31  ;;  %505 = vmatpush.msra.mxu0 %v2038_v29 }
  0x50   :  { %541 = vmatpush.msrb.mxu2 %v2034_v28  ;;  %562 = vmatpush.msrb.mxu3 %v2040_v30 }
  0x51   :  { %524 = vmatpush.msrb.mxu1 %v2059_v36  ;;  %506 = vmatpush.msra.mxu0 %v2049_v33 }
  0x52   :  { %542 = vmatpush.msrb.mxu2 %v2046_v32  ;;  %563 = vmatpush.msrb.mxu3 %v2051_v34 }
  0x53   :  { %1575 = vmatmul.msk.f32.gmra.mxu1 %vm105_vm0, %v1997_v6  ;;  %1583 = vmatmul.msk.f32.gmra.mxu2 %vm105_vm0, %v1997_v6 }
  0x54   :  { %1591 = vmatmul.msk.f32.gmra.mxu3 %vm105_vm0, %v1997_v6  ;;  %543 = vmatpush.msrb.mxu2 %v2077_v41  ;;  %v3104_v6 = vld [vmem:[#allocation21_spill] sm:$0xff] }
  0x55   :  { %564 = vmatpush.msrb.mxu3 %v2071_v39  ;;  %525 = vmatpush.msrb.mxu1 %v2069_v38 }
  0x56   :  { %544 = vmatpush.msrb.mxu2 %v2089_v45  ;;  %507 = vmatpush.msra.mxu0 %v2064_v37 }
  0x57   :  { %565 = vmatpush.msrb.mxu3 %v2083_v43  ;;  %526 = vmatpush.msrb.mxu1 %v2081_v42 }
  0x58   :  { %545 = vmatpush.msrb.mxu2 %v2102_v49  ;;  %508 = vmatpush.msra.mxu0 %v2075_v40 }
  0x59   :  { %566 = vmatpush.msrb.mxu3 %v2095_v47  ;;  %527 = vmatpush.msrb.mxu1 %v2093_v46 }
  0x5a   :  { %546 = vmatpush.msrb.mxu2 %v2120_v54  ;;  %509 = vmatpush.msra.mxu0 %v2086_v44 }
  0x5b   :  { %1576 = vmatmul.msk.f32.gmra.mxu1 %vm105_vm0, %v2002_v7  ;;  %1584 = vmatmul.msk.f32.gmra.mxu2 %vm105_vm0, %v2002_v7 }
  0x5c   :  { %1592 = vmatmul.msk.f32.gmra.mxu3 %vm105_vm0, %v2002_v7  ;;  %547 = vmatpush.msrb.mxu2 %v2132_v58  ;;  %v3105_v7 = vld [vmem:[#allocation25_spill] sm:$0xff] }
  0x5d   :  { %567 = vmatpush.msrb.mxu3 %v2113_v52  ;;  %528 = vmatpush.msrb.mxu1 %v2111_v51 }
  0x5e   :  { %548 = vmatpush.msrb.mxu2 %v2145_v62  ;;  %510 = vmatpush.msra.mxu0 %v2106_v50 }
  0x5f   :  { %568 = vmatpush.msrb.mxu3 %v2126_v56  ;;  %529 = vmatpush.msrb.mxu1 %v2124_v55 }
  0x60   :  { %549 = vmatpush.msrb.mxu2 %v2163_v3  ;;  %511 = vmatpush.msra.mxu0 %v2118_v53 }
  0x61   :  { %569 = vmatpush.msrb.mxu3 %v2138_v60  ;;  %530 = vmatpush.msrb.mxu1 %v2136_v59 }
  0x62   :  { %550 = vmatpush.msrb.mxu2 %v2175_v10  ;;  %512 = vmatpush.msra.mxu0 %v2128_v57 }
  0x63   :  { %394 = vmatmul.f32.vlgmr.msra.gmra.mxu1 %v3103_v5  ;;  %414 = vmatmul.f32.vlgmr.msra.gmra.mxu2 %v3103_v5 }
  0x64   :  { %434 = vmatmul.f32.vlgmr.msra.gmra.mxu3 %v3103_v5  ;;  %531 = vmatpush.msrb.mxu1 %v2154_v0  ;;  %v3106_v5 = vld [vmem:[#allocation12_spill] sm:$0xff] }
  0x65   :  { %570 = vmatpush.msrb.mxu3 %v2156_v1  ;;  %551 = vmatpush.msrb.mxu2 %v2187_v16 }
  0x66   :  { %532 = vmatpush.msrb.mxu1 %v2167_v4  ;;  %513 = vmatpush.msra.mxu0 %v2149_v63 }
  0x67   :  { %571 = vmatpush.msrb.mxu3 %v2169_v8  ;;  %552 = vmatpush.msrb.mxu2 %v2201_v20 }
  0x68   :  { %533 = vmatpush.msrb.mxu1 %v2179_v12  ;;  %514 = vmatpush.msra.mxu0 %v2161_v2 }
  0x69   :  { %572 = vmatpush.msrb.mxu3 %v2181_v13  ;;  %553 = vmatpush.msrb.mxu2 %v2211_v35 }
  0x6a   :  { %534 = vmatpush.msrb.mxu1 %v2194_v17  ;;  %515 = vmatpush.msra.mxu0 %v3104_v6 }
  0x6b   :  { %573 = vmatpush.msrb.mxu3 %v2197_v18  ;;  %554 = vmatpush.msrb.mxu2 %v2221_v61 }
  0x6c   :  { %535 = vmatpush.msrb.mxu1 %v2205_v22  ;;  %516 = vmatpush.msra.mxu0 %v3105_v7 }
  0x6d   :  { %574 = vmatpush.msrb.mxu3 %v2207_v23  ;;  %555 = vmatpush.msrb.mxu2 %v2226_v21 }
  0x6e   :  { %536 = vmatpush.msrb.mxu1 %v2214_v48  ;;  %644 = vmatpush.msrb.mxu0 %v3106_v5 }
  0x6f   :  { %575 = vmatpush.msrb.mxu3 %v2216_v14  ;;  %556 = vmatpush.msrb.mxu2 %v2237_v11 }
  0x70   :  { %664 = vmatpush.msra.mxu1 %v2023_v24  ;;  %645 = vmatpush.msrb.mxu0 %v2013_v15 }
  0x71   :  { %576 = vmatpush.msrb.mxu3 %v2230_v9  ;;  %684 = vmatpush.msra.mxu2 %v2034_v28 }
  0x72   :  { %665 = vmatpush.msra.mxu1 %v2032_v27  ;;  %646 = vmatpush.msrb.mxu0 %v2016_v19 }
  0x73   :  { %704 = vmatpush.msra.mxu3 %v2026_v25  ;;  %685 = vmatpush.msra.mxu2 %v2046_v32 }
  0x74   :  { %666 = vmatpush.msra.mxu1 %v2044_v31  ;;  %647 = vmatpush.msrb.mxu0 %v2028_v26 }
  0x75   :  { %705 = vmatpush.msra.mxu3 %v2040_v30  ;;  %686 = vmatpush.msra.mxu2 %v2077_v41 }
  0x76   :  { %667 = vmatpush.msra.mxu1 %v2059_v36  ;;  %648 = vmatpush.msrb.mxu0 %v2038_v29 }
  0x77   :  { %706 = vmatpush.msra.mxu3 %v2051_v34  ;;  %687 = vmatpush.msra.mxu2 %v2089_v45 }
  0x78   :  { %668 = vmatpush.msra.mxu1 %v2069_v38  ;;  %649 = vmatpush.msrb.mxu0 %v2049_v33 }
  0x79   :  { %707 = vmatpush.msra.mxu3 %v2071_v39  ;;  %688 = vmatpush.msra.mxu2 %v2102_v49 }
  0x7a   :  { %669 = vmatpush.msra.mxu1 %v2081_v42  ;;  %650 = vmatpush.msrb.mxu0 %v2064_v37 }
  0x7b   :  { %708 = vmatpush.msra.mxu3 %v2083_v43  ;;  %689 = vmatpush.msra.mxu2 %v2120_v54 }
  0x7c   :  { %670 = vmatpush.msra.mxu1 %v2093_v46  ;;  %651 = vmatpush.msrb.mxu0 %v2075_v40 }
  0x7d   :  { %709 = vmatpush.msra.mxu3 %v2095_v47  ;;  %690 = vmatpush.msra.mxu2 %v2132_v58 }
  0x7e   :  { %671 = vmatpush.msra.mxu1 %v2111_v51  ;;  %652 = vmatpush.msrb.mxu0 %v2086_v44 }
  0x7f   :  { %710 = vmatpush.msra.mxu3 %v2113_v52  ;;  %691 = vmatpush.msra.mxu2 %v2145_v62 }
  0x80   :  { %672 = vmatpush.msra.mxu1 %v2124_v55  ;;  %653 = vmatpush.msrb.mxu0 %v2106_v50 }
  0x81   :  { %711 = vmatpush.msra.mxu3 %v2126_v56  ;;  %692 = vmatpush.msra.mxu2 %v2163_v3 }
  0x82   :  { %673 = vmatpush.msra.mxu1 %v2136_v59  ;;  %654 = vmatpush.msrb.mxu0 %v2118_v53 }
  0x83   :  { %712 = vmatpush.msra.mxu3 %v2138_v60  ;;  %693 = vmatpush.msra.mxu2 %v2175_v10 }
  0x84   :  { %674 = vmatpush.msra.mxu1 %v2154_v0  ;;  %655 = vmatpush.msrb.mxu0 %v2128_v57 }
  0x85   :  { %713 = vmatpush.msra.mxu3 %v2156_v1  ;;  %694 = vmatpush.msra.mxu2 %v2187_v16 }
  0x86   :  { %675 = vmatpush.msra.mxu1 %v2167_v4  ;;  %656 = vmatpush.msrb.mxu0 %v2149_v63 }
  0x87   :  { %714 = vmatpush.msra.mxu3 %v2169_v8  ;;  %695 = vmatpush.msra.mxu2 %v2201_v20 }
  0x88   :  { %676 = vmatpush.msra.mxu1 %v2179_v12  ;;  %657 = vmatpush.msrb.mxu0 %v2161_v2 }
  0x89   :  { %715 = vmatpush.msra.mxu3 %v2181_v13  ;;  %696 = vmatpush.msra.mxu2 %v2211_v35 }
  0x8a   :  { %677 = vmatpush.msra.mxu1 %v2194_v17  ;;  %658 = vmatpush.msrb.mxu0 %v3104_v6  ;;  %v95_v17 = vld [vmem:[%s2972_s3] sm:$0xf] }
  0x8b   :  { %716 = vmatpush.msra.mxu3 %v2197_v18  ;;  %697 = vmatpush.msra.mxu2 %v2221_v61  ;;  %v2403_v20 = vperm.slane %v95_v17, 2 }
  0x8c   :  { %678 = vmatpush.msra.mxu1 %v2205_v22  ;;  %659 = vmatpush.msrb.mxu0 %v3105_v7 }
  0x8d   :  { %717 = vmatpush.msra.mxu3 %v2207_v23  ;;  %698 = vmatpush.msra.mxu2 %v2226_v21  ;;  %v97_v23 = vperm.slane %v95_v17, 0 }
  0x8e   :  { %679 = vmatpush.msra.mxu1 %v2214_v48 }
  0x8f   :  { %718 = vmatpush.msra.mxu3 %v2216_v14  ;;  %699 = vmatpush.msra.mxu2 %v2237_v11  ;;  %v98_v11 = vperm.slane %v95_v17, 1 }
  0x91   :  { %719 = vmatpush.msra.mxu3 %v2230_v9 }
  0x95   :  { %v147_v6 = vpop.f32.mrf.mxu0  ;;  %v162_v61 = vpop.f32.mrf.mxu1 }
  0x96   :  { %v2387_v22 = vadd.f32 %v162_v61, %v97_v23 }
  0x98   :  { %3107 = vst [vmem:[#allocation12_spill] sm:$0xff] %v2387_v22 }
  0x9c   :  { %v165_v21 = vpop.f32.mrf.mxu2  ;;  %v168_v2 = vpop.f32.mrf.mxu3 }
  0x9d   :  { %v2389_v14 = vadd.f32 %v165_v21, %v97_v23  ;;  %v2391_v7 = vadd.f32 %v168_v2, %v97_v23  ;;  %v100_v21 = vperm.slane %v95_v17, 3 }
  0x9e   :  { %v150_v48 = vpop.f32.mrf.mxu0 }
  0x9f   :  { %3108 = vst [vmem:[#allocation39_spill] sm:$0xff] %v2389_v14  ;;  %v2393_v18 = vadd.f32 %v150_v48, %v97_v23  ;;  %v188_v35 = vpop.f32.mrf.mxu1 }
  0xa0   :  { %3109 = vst [vmem:[#allocation40_spill] sm:$0xff] %v2391_v7 }
  0xa1   :  { %3110 = vst [vmem:[#allocation41_spill] sm:$0xff] %v2393_v18 }
  0xa5   :  { %v2395_v12 = vpop.f32.mrf.mxu2 }
  0xa6   :  { %v2397_v63 = vpop.f32.mrf.mxu3  ;;  %v153_v9 = vpop.f32.mrf.mxu0 }
  0xa7   :  { %v2399_v13 = vadd.f32 %v153_v9, %v97_v23  ;;  %v191_v61 = vpop.f32.mrf.mxu1 }
  0xa8   :  { %v2401_v22 = vadd.f32 %v191_v61, %v98_v11 }
  0xa9   :  { %3111 = vst [vmem:[#allocation42_spill] sm:$0xff] %v2399_v13 }
  0xaa   :  { %3112 = vst [vmem:[#allocation43_spill] sm:$0xff] %v2401_v22 }
  0xad   :  { %v232_v2 = vpop.f32.mrf.mxu2 }
  0xae   :  { %v2406_v7 = vadd.f32 %v232_v2, %v2403_v20  ;;  %v273_v48 = vpop.f32.mrf.mxu3  ;;  %v156_v14 = vpop.f32.mrf.mxu0 }
  0xaf   :  { %v2408_v18 = vadd.f32 %v273_v48, %v100_v21  ;;  %v2410_v4 = vadd.f32 %v156_v14, %v97_v23  ;;  %v194_v57 = vpop.f32.mrf.mxu1 }
  0xb0   :  { %3113 = vst [vmem:[#allocation44_spill] sm:$0xff] %v2406_v7  ;;  %v2412_v8 = vadd.f32 %v194_v57, %v98_v11 }
  0xb1   :  { %3114 = vst [vmem:[#allocation45_spill] sm:$0xff] %v2408_v18 }
  0xb2   :  { %3115 = vst [vmem:[#allocation46_spill] sm:$0xff] %v2410_v4 }
  0xb3   :  { %3116 = vst [vmem:[#allocation47_spill] sm:$0xff] %v2412_v8 }
  0xb5   :  { %v235_v9 = vpop.f32.mrf.mxu2 }
  0xb6   :  { %v2415_v61 = vadd.f32 %v235_v9, %v2403_v20  ;;  %v276_v13 = vpop.f32.mrf.mxu3  ;;  %v159_v22 = vpop.f32.mrf.mxu0 }
  0xb7   :  { %v2417_v17 = vadd.f32 %v276_v13, %v100_v21  ;;  %v2419_v16 = vadd.f32 %v159_v22, %v97_v23  ;;  %v197_v2 = vpop.f32.mrf.mxu1 }
  0xb8   :  { %3117 = vst [vmem:[#allocation48_spill] sm:$0xff] %v2415_v61  ;;  %v2421_v7 = vadd.f32 %v197_v2, %v98_v11 }
  0xb9   :  { %3118 = vst [vmem:[#allocation49_spill] sm:$0xff] %v2417_v17  ;;  %v148_v17 = vadd.f32 %v147_v6, %v97_v23 }
  0xba   :  { %3119 = vst [vmem:[#allocation50_spill] sm:$0xff] %v2419_v16 }
  0xbb   :  { %3120 = vst [vmem:[#allocation51_spill] sm:$0xff] %v2421_v7 }
  0xbd   :  { %v238_v48 = vpop.f32.mrf.mxu2 }
  0xbe   :  { %v2424_v14 = vadd.f32 %v238_v48, %v2403_v20  ;;  %v279_v4 = vpop.f32.mrf.mxu3 }
  0xbf   :  { %v2426_v57 = vadd.f32 %v279_v4, %v100_v21  ;;  %v200_v8 = vpop.f32.mrf.mxu1 }
  0xc0   :  { %3121 = vst [vmem:[#allocation52_spill] sm:$0xff] %v2424_v14  ;;  %v2428_v18 = vadd.f32 %v200_v8, %v98_v11  ;;  %v375_v7 = vpop.f32.mrf.mxu0 }
  0xc1   :  { %3122 = vst [vmem:[#allocation53_spill] sm:$0xff] %v2426_v57  ;;  %v376_v48 = vadd.f32 %v375_v7, %v148_v17 }
  0xc2   :  { %3123 = vst [vmem:[#allocation54_spill] sm:$0xff] %v2428_v18 }
  0xc3   :  { %v1593_v0 = vmul.f32 -1.442695, %v376_v48 }
  0xc5   :  { %v241_v9 = vpop.f32.mrf.mxu2  ;;  %1639 = vpow2.f32 %v1593_v0 }
  0xc6   :  { %v2431_v61 = vadd.f32 %v241_v9, %v2403_v20  ;;  %v282_v13 = vpop.f32.mrf.mxu3 }
  0xc7   :  { %v2433_v22 = vadd.f32 %v282_v13, %v100_v21 }
  0xc8   :  { %3124 = vst [vmem:[#allocation55_spill] sm:$0xff] %v2431_v61  ;;  %v203_v16 = vpop.f32.mrf.mxu1 }
  0xc9   :  { %3125 = vst [vmem:[#allocation56_spill] sm:$0xff] %v2433_v22  ;;  %v2435_v2 = vadd.f32 %v203_v16, %v98_v11 }
  0xcb   :  { %3126 = vst [vmem:[#allocation57_spill] sm:$0xff] %v2435_v2  ;;  %v1640_v7 = vpop.eup %1639 }
  0xcc   :  { %v441_v17 = vadd.f32 1.0, %v1640_v7 }
  0xcd   :  { %v244_v14 = vpop.f32.mrf.mxu2 }
  0xce   :  { %v2438_v4 = vadd.f32 %v244_v14, %v2403_v20  ;;  %v285_v57 = vpop.f32.mrf.mxu3  ;;  %1641 = vrcp.f32 %v441_v17  ;;  %vm447_vm2 = vweird.f32 %v441_v17 }
  0xcf   :  { %v2440_v8 = vadd.f32 %v285_v57, %v100_v21  ;;  %v189_v57 = vadd.f32 %v188_v35, %v98_v11 }
  0xd0   :  { %3127 = vst [vmem:[#allocation58_spill] sm:$0xff] %v2438_v4  ;;  %v206_v18 = vpop.f32.mrf.mxu1 }
  0xd1   :  { %3128 = vst [vmem:[#allocation59_spill] sm:$0xff] %v2440_v8  ;;  %v2442_v9 = vadd.f32 %v206_v18, %v98_v11 }
  0xd3   :  { %3129 = vst [vmem:[#allocation60_spill] sm:$0xff] %v2442_v9 }
  0xd6   :  { %v247_v13 = vpop.f32.mrf.mxu2 }
  0xd7   :  { %v2445_v61 = vadd.f32 %v247_v13, %v2403_v20  ;;  %v288_v16 = vpop.f32.mrf.mxu3 }
  0xd8   :  { %v2447_v2 = vadd.f32 %v288_v16, %v100_v21  ;;  %v209_v23 = vpop.f32.mrf.mxu1  ;;  %v271_v16 = vadd.f32 %v2397_v63, %v100_v21 }
  0xd9   :  { %3130 = vst [vmem:[#allocation61_spill] sm:$0xff] %v2445_v61  ;;  %v2449_v6 = vadd.f32 %v209_v23, %v98_v11  ;;  %v1642_v23 = vpop.eup %1641 }
  0xda   :  { %3131 = vst [vmem:[#allocation62_spill] sm:$0xff] %v2447_v2  ;;  %v443_v8 = vmul.f32 %v1642_v23, %v441_v17  ;;  %vm448_vm1 = vweird.f32 %v1642_v23 }
  0xdb   :  { %3132 = vst [vmem:[#allocation63_spill] sm:$0xff] %v2449_v6  ;;  %vm449_vm4 = vmor %vm447_vm2, %vm448_vm1 }
  0xdc   :  { %v444_v35 = vsub.f32 1.0, %v443_v8  ;;  %v451_v8 = vand.u32 2147483647, %v441_v17 }
  0xde   :  { %v250_v14 = vpop.f32.mrf.mxu2  ;;  %vm452_vm7 = vcmp.eq.f32.partialorder %v451_v8, 8.507059e+37 }
  0xdf   :  { %v2452_v4 = vadd.f32 %v250_v14, %v2403_v20  ;;  %v291_v18 = vpop.f32.mrf.mxu3 }
  0xe0   :  { %v2454_v48 = vadd.f32 %v291_v18, %v100_v21  ;;  %v395_v0 = vpop.f32.mrf.mxu1  ;;  %v230_v18 = vadd.f32 %v2395_v12, %v2403_v20 }
  0xe1   :  { %3133 = vst [vmem:[#allocation64_spill] sm:$0xff] %v2452_v4  ;;  %v396_v9 = vadd.f32 %v395_v0, %v189_v57 }
  0xe2   :  { %3134 = vst [vmem:[#allocation65_spill] sm:$0xff] %v2454_v48 }
  0xe3   :  { %v1594_v13 = vmul.f32 -1.442695, %v396_v9  ;;  %v445_v9 = vmul.f32 %v1642_v23, %v444_v35 }
  0xe5   :  { %1643 = vpow2.f32 %v1594_v13 }
  0xe6   :  { %v415_v14 = vpop.f32.mrf.mxu2 }
  0xe7   :  { %v435_v61 = vpop.f32.mrf.mxu3  ;;  %v416_v0 = vadd.f32 %v415_v14, %v230_v18 }
  0xe8   :  { %v436_v6 = vadd.f32 %v435_v61, %v271_v16  ;;  %v446_v61 = vadd.f32 %v1642_v23, %v445_v9 }
  0xea   :  { %v1595_v2 = vmul.f32 -1.442695, %v436_v6  ;;  %v450_v20 = vsel %vm449_vm4, %v1642_v23, %v446_v61 }
  0xeb   :  { %v1644_v7 = vpop.eup %1643 }
  0xec   :  { %v460_v11 = vadd.f32 1.0, %v1644_v7  ;;  %1645 = vpow2.f32 %v1595_v2  ;;  %v453_v2 = vand.u32 2147483648, %v441_v17 }
  0xee   :  { %1647 = vrcp.f32 %v460_v11  ;;  %v472_v6 = vand.u32 2147483648, %v460_v11  ;;  %v470_v7 = vand.u32 2147483647, %v460_v11  ;;  %vm466_vm5 = vweird.f32 %v460_v11 }
  0xf0   :  { %v473_v18 = vor.u32 1.1754944e-38, %v472_v6  ;;  %vm471_vm8 = vcmp.eq.f32.partialorder %v470_v7, 8.507059e+37 }
  0xf2   :  { %v1646_v57 = vpop.eup %1645 }
  0xf3   :  { %v480_v13 = vadd.f32 1.0, %v1646_v57  ;;  %v454_v57 = vor.u32 1.1754944e-38, %v453_v2 }
  0xf4   :  { %v1648_v4 = vpop.eup %1647 }
  0xf5   :  { %v462_v63 = vmul.f32 %v1648_v4, %v460_v11  ;;  %1649 = vrcp.f32 %v480_v13  ;;  %vm467_vm3 = vweird.f32 %v1648_v4  ;;  %v492_v23 = vand.u32 2147483648, %v480_v13 }
  0xf6   :  { %1651 = vtanh.f32 %v416_v0  ;;  %vm468_vm6 = vmor %vm466_vm5, %vm467_vm3  ;;  %vm486_vm10 = vweird.f32 %v480_v13  ;;  %v490_v11 = vand.u32 2147483647, %v480_v13 }
  0xf7   :  { %v463_v21 = vsub.f32 1.0, %v462_v63  ;;  %v455_v63 = vsel %vm452_vm7, %v454_v57, %v450_v20  ;;  %v493_v6 = vor.u32 1.1754944e-38, %v492_v23  ;;  %v3164_v20 = vld [vmem:[#allocation44_spill] sm:$0xff] }
  0xf8   :  { %vm491_vm12 = vcmp.eq.f32.partialorder %v490_v11, 8.507059e+37 }
  0xf9   :  { %v464_v16 = vmul.f32 %v1648_v4, %v463_v21 }
  0xfb   :  { %v1650_v12 = vpop.eup %1649  ;;  %v465_v35 = vadd.f32 %v1648_v4, %v464_v16 }
  0xfc   :  { %v1652_v14 = vpop.eup %1651  ;;  %v482_v0 = vmul.f32 %v1650_v12, %v480_v13  ;;  %vm487_vm9 = vweird.f32 %v1650_v12 }
  0xfd   :  { %v469_v9 = vsel %vm468_vm6, %v1648_v4, %v465_v35  ;;  %v497_v17 = vmul.f32 %v1652_v14, %v455_v63  ;;  %vm488_vm11 = vmor %vm486_vm10, %vm487_vm9 }
  0xfe   :  { %v474_v48 = vsel %vm471_vm8, %v473_v18, %v469_v9  ;;  %v483_v22 = vsub.f32 1.0, %v482_v0 }
  0xff   :  { %v496_v21 = vmul.f32 0.0, %v474_v48 }
 0x100   :  { %v484_v53 = vmul.f32 %v1650_v12, %v483_v22 }
 0x101   :  { %v2459_v1 = vadd.f32 %v497_v17, %v496_v21 }
 0x102   :  { %v485_v10 = vadd.f32 %v1650_v12, %v484_v53 }
 0x103   :  { %1653 = vtanh.f32 %v2459_v1 }
 0x104   :  { %v489_v61 = vsel %vm488_vm11, %v1650_v12, %v485_v10 }
 0x105   :  { %v494_v2 = vsel %vm491_vm12, %v493_v6, %v489_v61 }
 0x109   :  { %v1654_v4 = vpop.eup %1653 }
 0x10a   :  { %v500_v16 = vmul.f32 %v1654_v4, %v494_v2 }
 0x10c   :  { %517 = vmatmul.f32.vlgmr.msra.gmra.mxu0 %v500_v16  ;;  %537 = vmatmul.f32.vlgmr.msrb.gmra.mxu1 %v500_v16 }
 0x10d   :  { %557 = vmatmul.f32.vlgmr.msrb.gmra.mxu2 %v500_v16  ;;  %577 = vmatmul.f32.vlgmr.msrb.gmra.mxu3 %v500_v16 }
 0x10e   :  { %787 = vmatpush.msra.mxu0 %v3106_v5  ;;  %807 = vmatpush.msrb.mxu1 %v2023_v24  ;;  %v3137_v24 = vld [vmem:[#allocation13_spill] sm:$0xff] }
 0x10f   :  { %827 = vmatpush.msrb.mxu2 %v2034_v28  ;;  %847 = vmatpush.msrb.mxu3 %v2026_v25  ;;  %v3138_v25 = vld [vmem:[#allocation16_spill] sm:$0xff]  ;;  %v3141_v28 = vld [vmem:[#allocation14_spill] sm:$0xff] }
 0x110   :  { %788 = vmatpush.msra.mxu0 %v2013_v15  ;;  %808 = vmatpush.msrb.mxu1 %v2032_v27  ;;  %v3135_v15 = vld [vmem:[#allocation22_spill] sm:$0xff]  ;;  %v3140_v27 = vld [vmem:[#allocation20_spill] sm:$0xff] }
 0x111   :  { %828 = vmatpush.msrb.mxu2 %v2046_v32  ;;  %848 = vmatpush.msrb.mxu3 %v2040_v30  ;;  %v3143_v30 = vld [vmem:[#allocation29_spill] sm:$0xff]  ;;  %v3145_v32 = vld [vmem:[#allocation15_spill] sm:$0xff] }
 0x112   :  { %789 = vmatpush.msra.mxu0 %v2016_v19  ;;  %809 = vmatpush.msrb.mxu1 %v2044_v31  ;;  %v3136_v19 = vld [vmem:[#allocation17_spill] sm:$0xff]  ;;  %v3144_v31 = vld [vmem:[#allocation24_spill] sm:$0xff] }
 0x113   :  { %829 = vmatpush.msrb.mxu2 %v2077_v41  ;;  %849 = vmatpush.msrb.mxu3 %v2051_v34  ;;  %v3147_v34 = vld [vmem:[#allocation32_spill] sm:$0xff]  ;;  %v3153_v41 = vld [vmem:[#allocation21_spill] sm:$0xff] }
 0x114   :  { %790 = vmatpush.msra.mxu0 %v2028_v26  ;;  %810 = vmatpush.msrb.mxu1 %v2059_v36  ;;  %v3139_v26 = vld [vmem:[#allocation26_spill] sm:$0xff]  ;;  %v3148_v36 = vld [vmem:[#allocation28_spill] sm:$0xff] }
 0x115   :  { %830 = vmatpush.msrb.mxu2 %v2089_v45  ;;  %850 = vmatpush.msrb.mxu3 %v2071_v39  ;;  %v3151_v39 = vld [vmem:[#allocation35_spill] sm:$0xff]  ;;  %v3157_v45 = vld [vmem:[#allocation25_spill] sm:$0xff] }
 0x116   :  { %791 = vmatpush.msra.mxu0 %v2038_v29  ;;  %811 = vmatpush.msrb.mxu1 %v2069_v38  ;;  %v3142_v29 = vld [vmem:[#allocation19_spill] sm:$0xff] }
 0x117   :  { %831 = vmatpush.msrb.mxu2 %v2102_v49  ;;  %851 = vmatpush.msrb.mxu3 %v2083_v43  ;;  %v3150_v38 = vld [vmem:[#allocation27_spill] sm:$0xff]  ;;  %v3155_v43 = vld [vmem:[#allocation36_spill] sm:$0xff]  ;;  %v3160_v49 = vld [vmem:[#allocation37_spill] sm:$0xff] }
 0x118   :  { %792 = vmatpush.msra.mxu0 %v2049_v33  ;;  %812 = vmatpush.msrb.mxu1 %v2081_v42  ;;  %v3146_v33 = vld [vmem:[#allocation23_spill] sm:$0xff]  ;;  %v3154_v42 = vld [vmem:[#allocation30_spill] sm:$0xff] }
 0x119   :  { %832 = vmatpush.msrb.mxu2 %v2120_v54  ;;  %852 = vmatpush.msrb.mxu3 %v2095_v47  ;;  %v3159_v47 = vld [vmem:[#allocation38_spill] sm:$0xff]  ;;  %v3162_v54 = vld [vmem:[#allocation43_spill] sm:$0xff] }
 0x11a   :  { %793 = vmatpush.msra.mxu0 %v2064_v37  ;;  %813 = vmatpush.msrb.mxu1 %v2093_v46  ;;  %v3149_v37 = vld [vmem:[#allocation18_spill] sm:$0xff]  ;;  %v3158_v46 = vld [vmem:[#allocation33_spill] sm:$0xff] }
 0x11b   :  { %833 = vmatpush.msrb.mxu2 %v2132_v58  ;;  %853 = vmatpush.msrb.mxu3 %v2113_v52  ;;  %v3161_v52 = vld [vmem:[#allocation41_spill] sm:$0xff] }
 0x11c   :  { %794 = vmatpush.msra.mxu0 %v2075_v40  ;;  %814 = vmatpush.msrb.mxu1 %v2111_v51  ;;  %v3152_v40 = vld [vmem:[#allocation31_spill] sm:$0xff] }
 0x11d   :  { %834 = vmatpush.msrb.mxu2 %v2145_v62  ;;  %854 = vmatpush.msrb.mxu3 %v2126_v56 }
 0x11e   :  { %795 = vmatpush.msra.mxu0 %v2086_v44  ;;  %815 = vmatpush.msrb.mxu1 %v2124_v55  ;;  %v3156_v44 = vld [vmem:[#allocation34_spill] sm:$0xff] }
 0x11f   :  { %835 = vmatpush.msrb.mxu2 %v2163_v3  ;;  %855 = vmatpush.msrb.mxu3 %v2138_v60  ;;  %v3163_v60 = vld [vmem:[#allocation45_spill] sm:$0xff] }
 0x120   :  { %796 = vmatpush.msra.mxu0 %v2106_v50  ;;  %816 = vmatpush.msrb.mxu1 %v2136_v59 }
 0x121   :  { %836 = vmatpush.msrb.mxu2 %v3135_v15  ;;  %856 = vmatpush.msrb.mxu3 %v3136_v19 }
 0x122   :  { %797 = vmatpush.msra.mxu0 %v3137_v24  ;;  %817 = vmatpush.msrb.mxu1 %v3138_v25 }
 0x123   :  { %837 = vmatpush.msrb.mxu2 %v3139_v26  ;;  %857 = vmatpush.msrb.mxu3 %v3140_v27 }
 0x124   :  { %798 = vmatpush.msra.mxu0 %v3141_v28  ;;  %818 = vmatpush.msrb.mxu1 %v3142_v29 }
 0x125   :  { %838 = vmatpush.msrb.mxu2 %v3143_v30  ;;  %858 = vmatpush.msrb.mxu3 %v3144_v31 }
 0x126   :  { %799 = vmatpush.msra.mxu0 %v3145_v32  ;;  %819 = vmatpush.msrb.mxu1 %v3146_v33 }
 0x127   :  { %839 = vmatpush.msrb.mxu2 %v3147_v34  ;;  %859 = vmatpush.msrb.mxu3 %v3148_v36 }
 0x128   :  { %800 = vmatpush.msra.mxu0 %v3149_v37  ;;  %820 = vmatpush.msrb.mxu1 %v3150_v38 }
 0x129   :  { %840 = vmatpush.msrb.mxu2 %v3151_v39  ;;  %860 = vmatpush.msrb.mxu3 %v3152_v40 }
 0x12a   :  { %801 = vmatpush.msra.mxu0 %v3153_v41  ;;  %821 = vmatpush.msrb.mxu1 %v3154_v42 }
 0x12b   :  { %841 = vmatpush.msrb.mxu2 %v3155_v43  ;;  %861 = vmatpush.msrb.mxu3 %v3156_v44 }
 0x12c   :  { %802 = vmatpush.msra.mxu0 %v3157_v45  ;;  %822 = vmatpush.msrb.mxu1 %v3158_v46 }
 0x12d   :  { %842 = vmatpush.msrb.mxu2 %v3159_v47  ;;  %862 = vmatpush.msrb.mxu3 %v3160_v49 }
 0x189   :  { %v518_v50 = vpop.f32.mrf.mxu0  ;;  %v538_v51 = vpop.f32.mrf.mxu1 }
 0x18a   :  { %v519_v53 = vadd.f32 %v518_v50, %v3161_v52  ;;  %v539_v55 = vadd.f32 %v538_v51, %v3162_v54 }
 0x18c   :  { %v1596_v56 = vmul.f32 -1.442695, %v519_v53  ;;  %v1597_v58 = vmul.f32 -1.442695, %v539_v55 }
 0x18e   :  { %1655 = vpow2.f32 %v1596_v56 }
 0x18f   :  { %1657 = vpow2.f32 %v1597_v58 }
 0x190   :  { %v578_v59 = vpop.f32.mrf.mxu3  ;;  %v558_v13 = vpop.f32.mrf.mxu2 }
 0x191   :  { %v579_v62 = vadd.f32 %v578_v59, %v3163_v60  ;;  %v559_v35 = vadd.f32 %v558_v13, %v3164_v20  ;;  %v2537_v59 = vld [vmem:[#allocation5 + $0x1e8] sm:$0xff]  ;;  %v2540_v60 = vld [vmem:[#allocation5 + $0x1f0] sm:$0xff] }
 0x192   :  { %v2561_v13 = vld [vmem:[#allocation5 + $0x1a8] sm:$0xff] }
 0x193   :  { %v1598_v3 = vmul.f32 -1.442695, %v579_v62  ;;  %v2543_v62 = vld [vmem:[#allocation5 + $0x1f8] sm:$0xff]  ;;  %v2573_v20 = vld [vmem:[#allocation5 + $0x188] sm:$0xff] }
 0x194   :  { %v1656_v10 = vpop.eup %1655 }
 0x195   :  { %v1658_v5 = vpop.eup %1657  ;;  %v584_v22 = vadd.f32 1.0, %v1656_v10  ;;  %1659 = vpow2.f32 %v1598_v3  ;;  %v2546_v3 = vld [vmem:[#allocation5 + $0x1c0] sm:$0xff]  ;;  %v2549_v10 = vld [vmem:[#allocation5 + $0x1c8] sm:$0xff] }
 0x196   :  { %v603_v48 = vadd.f32 1.0, %v1658_v5  ;;  %v2552_v5 = vld [vmem:[#allocation5 + $0x1d0] sm:$0xff] }
 0x197   :  { %1661 = vrcp.f32 %v584_v22  ;;  %v596_v63 = vand.u32 2147483648, %v584_v22  ;;  %v594_v23 = vand.u32 2147483647, %v584_v22  ;;  %vm590_vm15 = vweird.f32 %v584_v22 }
 0x198   :  { %1663 = vrcp.f32 %v603_v48  ;;  %v615_v21 = vand.u32 2147483648, %v603_v48  ;;  %v613_v61 = vand.u32 2147483647, %v603_v48  ;;  %vm609_vm0 = vweird.f32 %v603_v48 }
 0x199   :  { %v597_v2 = vor.u32 1.1754944e-38, %v596_v63  ;;  %vm595_vm3 = vcmp.eq.f32.partialorder %v594_v23, 8.507059e+37  ;;  %v2594_v63 = vld [vmem:[#allocation5 + $0x140] sm:$0xff]  ;;  %v2603_v23 = vld [vmem:[#allocation5 + $0x158] sm:$0xff] }
 0x19a   :  { %v616_v24 = vor.u32 1.1754944e-38, %v615_v21  ;;  %vm614_vm4 = vcmp.eq.f32.partialorder %v613_v61, 8.507059e+37  ;;  %v2597_v21 = vld [vmem:[#allocation5 + $0x148] sm:$0xff] }
 0x19b   :  { %v1660_v8 = vpop.eup %1659  ;;  %v2609_v61 = vld [vmem:[#allocation5 + $0x128] sm:$0xff] }
 0x19c   :  { %v623_v7 = vadd.f32 1.0, %v1660_v8  ;;  %v2564_v8 = vld [vmem:[#allocation5 + $0x1b0] sm:$0xff] }
 0x19d   :  { %v1662_v12 = vpop.eup %1661 }
 0x19e   :  { %v1664_v14 = vpop.eup %1663  ;;  %v586_v18 = vmul.f32 %v1662_v12, %v584_v22  ;;  %1665 = vrcp.f32 %v623_v7  ;;  %vm591_vm13 = vweird.f32 %v1662_v12  ;;  %v635_v51 = vand.u32 2147483648, %v623_v7  ;;  %v2555_v22 = vld [vmem:[#allocation5 + $0x1d8] sm:$0xff] }
 0x19f   :  { %v605_v57 = vmul.f32 %v1664_v14, %v603_v48  ;;  %1667 = vtanh.f32 %v559_v35  ;;  %vm610_vm14 = vweird.f32 %v1664_v14  ;;  %vm592_vm1 = vmor %vm590_vm15, %vm591_vm13  ;;  %vm629_vm6 = vweird.f32 %v623_v7  ;;  %v2558_v48 = vld [vmem:[#allocation5 + $0x1a0] sm:$0xff]  ;;  %v2576_v35 = vld [vmem:[#allocation5 + $0x190] sm:$0xff] }
 0x1a0   :  { %v587_v0 = vsub.f32 1.0, %v586_v18  ;;  %vm611_vm2 = vmor %vm609_vm0, %vm610_vm14  ;;  %v633_v52 = vand.u32 2147483647, %v623_v7  ;;  %v636_v54 = vor.u32 1.1754944e-38, %v635_v51  ;;  %v2582_v18 = vld [vmem:[#allocation5 + $0x160] sm:$0xff] }
 0x1a1   :  { %v606_v9 = vsub.f32 1.0, %v605_v57  ;;  %v2585_v57 = vld [vmem:[#allocation5 + $0x168] sm:$0xff]  ;;  %v2662_v51 = vld [vmem:[#allocation5 + $0x80] sm:$0xff] }
 0x1a2   :  { %v588_v17 = vmul.f32 %v1662_v12, %v587_v0  ;;  %vm634_vm8 = vcmp.eq.f32.partialorder %v633_v52, 8.507059e+37  ;;  %v2588_v0 = vld [vmem:[#allocation5 + $0x170] sm:$0xff]  ;;  %3169 = vst [vmem:[#allocation26_spill] sm:$0xff] %v2662_v51  ;;  %v2669_v52 = vld [vmem:[#allocation5 + $0x98] sm:$0xff] }
 0x1a3   :  { %v607_v11 = vmul.f32 %v1664_v14, %v606_v9  ;;  %v2591_v9 = vld [vmem:[#allocation5 + $0x178] sm:$0xff]  ;;  %3171 = vst [vmem:[#allocation14_spill] sm:$0xff] %v2669_v52 }
 0x1a4   :  { %v1666_v6 = vpop.eup %1665  ;;  %v589_v4 = vadd.f32 %v1662_v12, %v588_v17  ;;  %v2600_v17 = vld [vmem:[#allocation5 + $0x150] sm:$0xff] }
 0x1a5   :  { %v608_v16 = vadd.f32 %v1664_v14, %v607_v11  ;;  %v625_v19 = vmul.f32 %v1666_v6, %v623_v7  ;;  %v1668_v27 = vpop.eup %1667  ;;  %vm630_vm5 = vweird.f32 %v1666_v6  ;;  %v2567_v7 = vld [vmem:[#allocation5 + $0x1b8] sm:$0xff]  ;;  %v2606_v11 = vld [vmem:[#allocation5 + $0x120] sm:$0xff] }
 0x1a6   :  { %v593_v25 = vsel %vm592_vm1, %v1662_v12, %v589_v4  ;;  %vm631_vm7 = vmor %vm629_vm6, %vm630_vm5  ;;  %v2570_v12 = vld [vmem:[#allocation5 + $0x180] sm:$0xff]  ;;  %v2615_v4 = vld [vmem:[#allocation5 + $0x138] sm:$0xff] }
 0x1a7   :  { %v598_v28 = vsel %vm595_vm3, %v597_v2, %v593_v25  ;;  %v612_v29 = vsel %vm611_vm2, %v1664_v14, %v608_v16  ;;  %v626_v31 = vsub.f32 1.0, %v625_v19  ;;  %v2579_v14 = vld [vmem:[#allocation5 + $0x198] sm:$0xff]  ;;  %v2618_v2 = vld [vmem:[#allocation5 + $0x100] sm:$0xff]  ;;  %v2621_v16 = vld [vmem:[#allocation5 + $0x108] sm:$0xff] }
 0x1a8   :  { %v617_v32 = vsel %vm614_vm4, %v616_v24, %v612_v29  ;;  %v640_v33 = vmul.f32 %v1668_v27, %v598_v28  ;;  %v2624_v19 = vld [vmem:[#allocation5 + $0x110] sm:$0xff]  ;;  %v2627_v24 = vld [vmem:[#allocation5 + $0x118] sm:$0xff]  ;;  %v2630_v25 = vld [vmem:[#allocation5 + $0xe0] sm:$0xff] }
 0x1a9   :  { %v639_v37 = vmul.f32 %v617_v32, %v2459_v1  ;;  %v627_v41 = vmul.f32 %v1666_v6, %v626_v31  ;;  %v2534_v1 = vld [vmem:[#allocation5 + $0x1e0] sm:$0xff]  ;;  %v2633_v27 = vld [vmem:[#allocation5 + $0xe8] sm:$0xff]  ;;  %v2636_v28 = vld [vmem:[#allocation5 + $0xf0] sm:$0xff] }
 0x1aa   :  { %v2639_v29 = vld [vmem:[#allocation5 + $0xf8] sm:$0xff]  ;;  %v2642_v31 = vld [vmem:[#allocation5 + $0xc0] sm:$0xff]  ;;  %v2645_v32 = vld [vmem:[#allocation5 + $0xc8] sm:$0xff] }
 0x1ab   :  { %v2531_v45 = vadd.f32 %v640_v33, %v639_v37  ;;  %v628_v50 = vadd.f32 %v1666_v6, %v627_v41  ;;  %v2649_v33 = vld [vmem:[#allocation5 + $0xd8] sm:$0xff]  ;;  %v2652_v37 = vld [vmem:[#allocation5 + $0xa0] sm:$0xff]  ;;  %v2655_v41 = vld [vmem:[#allocation5 + $0xa8] sm:$0xff] }
 0x1ac   :  { %3165 = vst [vmem:[#allocation22_spill] sm:$0xff] %v2649_v33 }
 0x1ad   :  { %1669 = vtanh.f32 %v2531_v45  ;;  %v632_v53 = vsel %vm631_vm7, %v1666_v6, %v628_v50  ;;  %v2612_v6 = vld [vmem:[#allocation5 + $0x130] sm:$0xff]  ;;  %3166 = vst [vmem:[#allocation17_spill] sm:$0xff] %v2652_v37  ;;  %v2659_v50 = vld [vmem:[#allocation5 + $0xb8] sm:$0xff] }
 0x1ae   :  { %v637_v56 = vsel %vm634_vm8, %v636_v54, %v632_v53  ;;  %3167 = vst [vmem:[#allocation13_spill] sm:$0xff] %v2655_v41  ;;  %v2672_v53 = vld [vmem:[#allocation5 + $0x60] sm:$0xff] }
 0x1af   :  { %3168 = vst [vmem:[#allocation16_spill] sm:$0xff] %v2659_v50  ;;  %v2680_v54 = vld [vmem:[#allocation5 + $0x40] sm:$0xff] }
 0x1b0   :  { %3172 = vst [vmem:[#allocation19_spill] sm:$0xff] %v2672_v53 }
 0x1b1   :  { %3174 = vst [vmem:[#allocation24_spill] sm:$0xff] %v2680_v54 }
 0x1b3   :  { %v1670_v55 = vpop.eup %1669 }
 0x1b4   :  { %v643_v58 = vmul.f32 %v1670_v55, %v637_v56  ;;  %v3178_v55 = vld [vmem:[#allocation47_spill] sm:$0xff] }
 0x1b6   :  { %660 = vmatmul.f32.vlgmr.msrb.gmra.mxu0 %v643_v58  ;;  %680 = vmatmul.f32.vlgmr.msra.gmra.mxu1 %v643_v58 }
 0x1b7   :  { %700 = vmatmul.f32.vlgmr.msra.gmra.mxu2 %v643_v58  ;;  %720 = vmatmul.f32.vlgmr.msra.gmra.mxu3 %v643_v58  ;;  %v3179_v58 = vld [vmem:[#allocation49_spill] sm:$0xff] }
 0x1b8   :  { %930 = vmatpush.msrb.mxu0 %v2534_v1  ;;  %950 = vmatpush.msra.mxu1 %v2537_v59 }
 0x1b9   :  { %970 = vmatpush.msra.mxu2 %v2540_v60  ;;  %990 = vmatpush.msra.mxu3 %v2543_v62 }
 0x1ba   :  { %931 = vmatpush.msrb.mxu0 %v2546_v3  ;;  %951 = vmatpush.msra.mxu1 %v2549_v10 }
 0x1bb   :  { %971 = vmatpush.msra.mxu2 %v2552_v5  ;;  %991 = vmatpush.msra.mxu3 %v2555_v22 }
 0x1bc   :  { %932 = vmatpush.msrb.mxu0 %v2558_v48  ;;  %952 = vmatpush.msra.mxu1 %v2561_v13 }
 0x1bd   :  { %972 = vmatpush.msra.mxu2 %v2564_v8  ;;  %992 = vmatpush.msra.mxu3 %v2567_v7 }
 0x1be   :  { %933 = vmatpush.msrb.mxu0 %v2570_v12  ;;  %953 = vmatpush.msra.mxu1 %v2573_v20 }
 0x1bf   :  { %973 = vmatpush.msra.mxu2 %v2576_v35  ;;  %993 = vmatpush.msra.mxu3 %v2579_v14 }
 0x1c0   :  { %934 = vmatpush.msrb.mxu0 %v2582_v18  ;;  %954 = vmatpush.msra.mxu1 %v2585_v57 }
 0x1c1   :  { %974 = vmatpush.msra.mxu2 %v2588_v0  ;;  %994 = vmatpush.msra.mxu3 %v2591_v9 }
 0x1c2   :  { %935 = vmatpush.msrb.mxu0 %v2594_v63  ;;  %955 = vmatpush.msra.mxu1 %v2597_v21 }
 0x1c3   :  { %975 = vmatpush.msra.mxu2 %v2600_v17  ;;  %995 = vmatpush.msra.mxu3 %v2603_v23 }
 0x1c4   :  { %936 = vmatpush.msrb.mxu0 %v2606_v11  ;;  %956 = vmatpush.msra.mxu1 %v2609_v61 }
 0x1c5   :  { %976 = vmatpush.msra.mxu2 %v2612_v6  ;;  %996 = vmatpush.msra.mxu3 %v2615_v4 }
 0x1c6   :  { %937 = vmatpush.msrb.mxu0 %v2618_v2  ;;  %957 = vmatpush.msra.mxu1 %v2621_v16 }
 0x1c7   :  { %977 = vmatpush.msra.mxu2 %v2624_v19  ;;  %997 = vmatpush.msra.mxu3 %v2627_v24 }
 0x1c8   :  { %938 = vmatpush.msrb.mxu0 %v2630_v25  ;;  %958 = vmatpush.msra.mxu1 %v2633_v27 }
 0x1c9   :  { %978 = vmatpush.msra.mxu2 %v2636_v28  ;;  %998 = vmatpush.msra.mxu3 %v2639_v29 }
 0x1ca   :  { %939 = vmatpush.msrb.mxu0 %v2642_v31  ;;  %959 = vmatpush.msra.mxu1 %v2645_v32 }
 0x1cb   :  { %979 = vmatpush.msra.mxu2 %v3135_v15  ;;  %999 = vmatpush.msra.mxu3 %v2649_v33  ;;  %v2665_v15 = vld [vmem:[#allocation5 + $0x88] sm:$0xff] }
 0x1cc   :  { %940 = vmatpush.msrb.mxu0 %v2652_v37  ;;  %960 = vmatpush.msra.mxu1 %v2655_v41  ;;  %3170 = vst [vmem:[#allocation20_spill] sm:$0xff] %v2665_v15 }
 0x1cd   :  { %980 = vmatpush.msra.mxu2 %v3139_v26  ;;  %1000 = vmatpush.msra.mxu3 %v2659_v50  ;;  %v2675_v26 = vld [vmem:[#allocation5 + $0x68] sm:$0xff] }
 0x1ce   :  { %941 = vmatpush.msrb.mxu0 %v2662_v51  ;;  %961 = vmatpush.msra.mxu1 %v2665_v15  ;;  %3173 = vst [vmem:[#allocation29_spill] sm:$0xff] %v2675_v26 }
 0x1cf   :  { %981 = vmatpush.msra.mxu2 %v3143_v30  ;;  %1001 = vmatpush.msra.mxu3 %v2669_v52  ;;  %v2686_v30 = vld [vmem:[#allocation5 + $0x20] sm:$0xff] }
 0x1d0   :  { %942 = vmatpush.msrb.mxu0 %v2672_v53  ;;  %962 = vmatpush.msra.mxu1 %v2675_v26  ;;  %3175 = vst [vmem:[#allocation15_spill] sm:$0xff] %v2686_v30 }
 0x1d1   :  { %982 = vmatpush.msra.mxu2 %v3147_v34  ;;  %1002 = vmatpush.msra.mxu3 %v3148_v36  ;;  %v2692_v34 = vld [vmem:[#allocation5] sm:$0xff] }
 0x1d2   :  { %943 = vmatpush.msrb.mxu0 %v2680_v54  ;;  %963 = vmatpush.msra.mxu1 %v3150_v38  ;;  %3176 = vst [vmem:[#allocation23_spill] sm:$0xff] %v2692_v34 }
 0x1d3   :  { %983 = vmatpush.msra.mxu2 %v3151_v39  ;;  %1003 = vmatpush.msra.mxu3 %v3152_v40  ;;  %v3177_v39 = vld [vmem:[#allocation42_spill] sm:$0xff] }
 0x1d4   :  { %944 = vmatpush.msrb.mxu0 %v2686_v30  ;;  %964 = vmatpush.msra.mxu1 %v3154_v42 }
 0x1d5   :  { %984 = vmatpush.msra.mxu2 %v3155_v43  ;;  %1004 = vmatpush.msra.mxu3 %v3156_v44 }
 0x1d6   :  { %945 = vmatpush.msrb.mxu0 %v2692_v34  ;;  %965 = vmatpush.msra.mxu1 %v3158_v46 }
 0x1d7   :  { %985 = vmatpush.msra.mxu2 %v3159_v47  ;;  %1005 = vmatpush.msra.mxu3 %v3160_v49 }
 0x233   :  { %v661_v36 = vpop.f32.mrf.mxu0  ;;  %v681_v38 = vpop.f32.mrf.mxu1 }
 0x234   :  { %v662_v40 = vadd.f32 %v661_v36, %v3177_v39  ;;  %v682_v42 = vadd.f32 %v681_v38, %v3178_v55  ;;  %v3180_v38 = vld [vmem:[#allocation48_spill] sm:$0xff] }
 0x236   :  { %v1599_v56 = vmul.f32 -1.442695, %v662_v40  ;;  %v1600_v43 = vmul.f32 -1.442695, %v682_v42 }
 0x238   :  { %1671 = vpow2.f32 %v1599_v56 }
 0x239   :  { %1673 = vpow2.f32 %v1600_v43 }
 0x23a   :  { %v721_v44 = vpop.f32.mrf.mxu3  ;;  %v701_v49 = vpop.f32.mrf.mxu2 }
 0x23b   :  { %v722_v30 = vadd.f32 %v721_v44, %v3179_v58  ;;  %v702_v40 = vadd.f32 %v701_v49, %v3180_v38 }
 0x23d   :  { %v1601_v34 = vmul.f32 -1.442695, %v722_v30 }
 0x23e   :  { %v1672_v54 = vpop.eup %1671 }
 0x23f   :  { %v1674_v46 = vpop.eup %1673  ;;  %v727_v26 = vadd.f32 1.0, %v1672_v54  ;;  %1675 = vpow2.f32 %v1601_v34 }
 0x240   :  { %v746_v47 = vadd.f32 1.0, %v1674_v46 }
 0x241   :  { %1677 = vrcp.f32 %v727_v26  ;;  %v739_v30 = vand.u32 2147483648, %v727_v26  ;;  %v737_v34 = vand.u32 2147483647, %v727_v26  ;;  %vm733_vm11 = vweird.f32 %v727_v26 }
 0x242   :  { %1679 = vrcp.f32 %v746_v47  ;;  %v758_v58 = vand.u32 2147483648, %v746_v47  ;;  %v756_v52 = vand.u32 2147483647, %v746_v47  ;;  %vm752_vm12 = vweird.f32 %v746_v47 }
 0x243   :  { %v740_v49 = vor.u32 1.1754944e-38, %v739_v30  ;;  %vm738_vm15 = vcmp.eq.f32.partialorder %v737_v34, 8.507059e+37 }
 0x244   :  { %vm757_vm0 = vcmp.eq.f32.partialorder %v756_v52, 8.507059e+37 }
 0x245   :  { %v1676_v53 = vpop.eup %1675 }
 0x246   :  { %v766_v36 = vadd.f32 1.0, %v1676_v53 }
 0x247   :  { %v1678_v39 = vpop.eup %1677 }
 0x248   :  { %v1680_v55 = vpop.eup %1679  ;;  %v729_v42 = vmul.f32 %v1678_v39, %v727_v26  ;;  %1681 = vrcp.f32 %v766_v36  ;;  %vm734_vm9 = vweird.f32 %v1678_v39  ;;  %v778_v30 = vand.u32 2147483648, %v766_v36 }
 0x249   :  { %v748_v56 = vmul.f32 %v1680_v55, %v746_v47  ;;  %1683 = vtanh.f32 %v702_v40  ;;  %vm753_vm10 = vweird.f32 %v1680_v55  ;;  %vm735_vm13 = vmor %vm733_vm11, %vm734_vm9  ;;  %vm772_vm2 = vweird.f32 %v766_v36 }
 0x24a   :  { %v730_v43 = vsub.f32 1.0, %v729_v42  ;;  %vm754_vm14 = vmor %vm752_vm12, %vm753_vm10  ;;  %v759_v42 = vor.u32 1.1754944e-38, %v758_v58  ;;  %v779_v34 = vor.u32 1.1754944e-38, %v778_v30  ;;  %v3199_v30 = vld [vmem:[#allocation15_spill] sm:$0xff] }
 0x24b   :  { %v749_v44 = vsub.f32 1.0, %v748_v56 }
 0x24c   :  { %v731_v54 = vmul.f32 %v1678_v39, %v730_v43 }
 0x24d   :  { %v750_v46 = vmul.f32 %v1680_v55, %v749_v44 }
 0x24e   :  { %v1682_v15 = vpop.eup %1681  ;;  %v732_v53 = vadd.f32 %v1678_v39, %v731_v54 }
 0x24f   :  { %v751_v38 = vadd.f32 %v1680_v55, %v750_v46  ;;  %v768_v51 = vmul.f32 %v1682_v15, %v766_v36  ;;  %v1684_v40 = vpop.eup %1683  ;;  %vm773_vm1 = vweird.f32 %v1682_v15  ;;  %v3188_v46 = vld [vmem:[#allocation20_spill] sm:$0xff] }
 0x250   :  { %v736_v56 = vsel %vm735_vm13, %v1678_v39, %v732_v53  ;;  %v776_v39 = vand.u32 2147483647, %v766_v36  ;;  %vm774_vm3 = vmor %vm772_vm2, %vm773_vm1  ;;  %v3187_v36 = vld [vmem:[#allocation26_spill] sm:$0xff]  ;;  %v2756_v53 = vld [vmem:[#allocation5 + $0x90] sm:$0xff] }
 0x251   :  { %v741_v50 = vsel %vm738_vm15, %v740_v49, %v736_v56  ;;  %v755_v43 = vsel %vm754_vm14, %v1680_v55, %v751_v38  ;;  %v769_v41 = vsub.f32 1.0, %v768_v51  ;;  %3189 = vst [vmem:[#allocation18_spill] sm:$0xff] %v2756_v53  ;;  %v3190_v49 = vld [vmem:[#allocation14_spill] sm:$0xff]  ;;  %v3191_v38 = vld [vmem:[#allocation19_spill] sm:$0xff]  ;;  %v2762_v56 = vld [vmem:[#allocation5 + $0x70] sm:$0xff] }
 0x252   :  { %v760_v44 = vsel %vm757_vm0, %v759_v42, %v755_v43  ;;  %v783_v37 = vmul.f32 %v1684_v40, %v741_v50  ;;  %vm777_vm4 = vcmp.eq.f32.partialorder %v776_v39, 8.507059e+37  ;;  %v2750_v50 = vld [vmem:[#allocation5 + $0xb0] sm:$0xff]  ;;  %3193 = vst [vmem:[#allocation27_spill] sm:$0xff] %v2762_v56  ;;  %v2765_v40 = vld [vmem:[#allocation5 + $0x78] sm:$0xff]  ;;  %v3195_v43 = vld [vmem:[#allocation24_spill] sm:$0xff] }
 0x253   :  { %v782_v33 = vmul.f32 %v760_v44, %v2531_v45  ;;  %v770_v54 = vmul.f32 %v1682_v15, %v769_v41  ;;  %v2744_v45 = vld [vmem:[#allocation5 + $0xd0] sm:$0xff]  ;;  %3185 = vst [vmem:[#allocation28_spill] sm:$0xff] %v2750_v50  ;;  %v2769_v44 = vld [vmem:[#allocation5 + $0x48] sm:$0xff] }
 0x254   :  { %3181 = vst [vmem:[#allocation32_spill] sm:$0xff] %v2744_v45  ;;  %v3184_v41 = vld [vmem:[#allocation13_spill] sm:$0xff]  ;;  %v2779_v39 = vld [vmem:[#allocation5 + $0x28] sm:$0xff] }
 0x255   :  { %v2703_v26 = vadd.f32 %v783_v37, %v782_v33  ;;  %v771_v47 = vadd.f32 %v1682_v15, %v770_v54  ;;  %v3182_v33 = vld [vmem:[#allocation22_spill] sm:$0xff]  ;;  %v3183_v37 = vld [vmem:[#allocation17_spill] sm:$0xff]  ;;  %3194 = vst [vmem:[#allocation35_spill] sm:$0xff] %v2765_v40 }
 0x256   :  { %v3192_v42 = vld [vmem:[#allocation29_spill] sm:$0xff]  ;;  %3196 = vst [vmem:[#allocation31_spill] sm:$0xff] %v2769_v44 }
 0x257   :  { %1685 = vtanh.f32 %v2703_v26  ;;  %v775_v58 = vsel %vm774_vm3, %v1682_v15, %v771_v47  ;;  %v3186_v15 = vld [vmem:[#allocation16_spill] sm:$0xff]  ;;  %v2772_v54 = vld [vmem:[#allocation5 + $0x50] sm:$0xff]  ;;  %v2775_v47 = vld [vmem:[#allocation5 + $0x58] sm:$0xff]  ;;  %3200 = vst [vmem:[#allocation36_spill] sm:$0xff] %v2779_v39 }
 0x258   :  { %v780_v51 = vsel %vm777_vm4, %v779_v34, %v775_v58  ;;  %3197 = vst [vmem:[#allocation21_spill] sm:$0xff] %v2772_v54  ;;  %v2782_v58 = vld [vmem:[#allocation5 + $0x30] sm:$0xff]  ;;  %v2785_v34 = vld [vmem:[#allocation5 + $0x38] sm:$0xff] }
 0x259   :  { %3198 = vst [vmem:[#allocation30_spill] sm:$0xff] %v2775_v47 }
 0x25a   :  { %3201 = vst [vmem:[#allocation34_spill] sm:$0xff] %v2782_v58 }
 0x25b   :  { %3202 = vst [vmem:[#allocation25_spill] sm:$0xff] %v2785_v34 }
 0x25d   :  { %v1686_v52 = vpop.eup %1685 }
 0x25e   :  { %v786_v55 = vmul.f32 %v1686_v52, %v780_v51  ;;  %v3203_v52 = vld [vmem:[#allocation23_spill] sm:$0xff]  ;;  %v2789_v51 = vld [vmem:[#allocation5 + $0x8] sm:$0xff] }
 0x25f   :  { %3204 = vst [vmem:[#allocation33_spill] sm:$0xff] %v2789_v51 }
 0x260   :  { %803 = vmatmul.f32.vlgmr.msra.gmra.mxu0 %v786_v55  ;;  %823 = vmatmul.f32.vlgmr.msrb.gmra.mxu1 %v786_v55 }
 0x261   :  { %843 = vmatmul.f32.vlgmr.msrb.gmra.mxu2 %v786_v55  ;;  %863 = vmatmul.f32.vlgmr.msrb.gmra.mxu3 %v786_v55  ;;  %v2792_v55 = vld [vmem:[#allocation5 + $0x10] sm:$0xff] }
 0x262   :  { %1073 = vmatpush.msra.mxu0 %v2534_v1  ;;  %1093 = vmatpush.msrb.mxu1 %v2537_v59  ;;  %3205 = vst [vmem:[#allocation38_spill] sm:$0xff] %v2792_v55 }
 0x263   :  { %1113 = vmatpush.msrb.mxu2 %v2540_v60  ;;  %1133 = vmatpush.msrb.mxu3 %v2543_v62 }
 0x264   :  { %1074 = vmatpush.msra.mxu0 %v2546_v3  ;;  %1094 = vmatpush.msrb.mxu1 %v2549_v10 }
 0x265   :  { %1114 = vmatpush.msrb.mxu2 %v2552_v5  ;;  %1134 = vmatpush.msrb.mxu3 %v2555_v22 }
 0x266   :  { %1075 = vmatpush.msra.mxu0 %v2558_v48  ;;  %1095 = vmatpush.msrb.mxu1 %v2561_v13 }
 0x267   :  { %1115 = vmatpush.msrb.mxu2 %v2564_v8  ;;  %1135 = vmatpush.msrb.mxu3 %v2567_v7 }
 0x268   :  { %1076 = vmatpush.msra.mxu0 %v2570_v12  ;;  %1096 = vmatpush.msrb.mxu1 %v2573_v20 }
 0x269   :  { %1116 = vmatpush.msrb.mxu2 %v2576_v35  ;;  %1136 = vmatpush.msrb.mxu3 %v2579_v14 }
 0x26a   :  { %1077 = vmatpush.msra.mxu0 %v2582_v18  ;;  %1097 = vmatpush.msrb.mxu1 %v2585_v57 }
 0x26b   :  { %1117 = vmatpush.msrb.mxu2 %v2588_v0  ;;  %1137 = vmatpush.msrb.mxu3 %v2591_v9 }
 0x26c   :  { %1078 = vmatpush.msra.mxu0 %v2594_v63  ;;  %1098 = vmatpush.msrb.mxu1 %v2597_v21 }
 0x26d   :  { %1118 = vmatpush.msrb.mxu2 %v2600_v17  ;;  %1138 = vmatpush.msrb.mxu3 %v2603_v23 }
 0x26e   :  { %1079 = vmatpush.msra.mxu0 %v2606_v11  ;;  %1099 = vmatpush.msrb.mxu1 %v2609_v61 }
 0x26f   :  { %1119 = vmatpush.msrb.mxu2 %v2612_v6  ;;  %1139 = vmatpush.msrb.mxu3 %v2615_v4 }
 0x270   :  { %1080 = vmatpush.msra.mxu0 %v2618_v2  ;;  %1100 = vmatpush.msrb.mxu1 %v2621_v16 }
 0x271   :  { %1120 = vmatpush.msrb.mxu2 %v2624_v19  ;;  %1140 = vmatpush.msrb.mxu3 %v2627_v24 }
 0x272   :  { %1081 = vmatpush.msra.mxu0 %v2630_v25  ;;  %1101 = vmatpush.msrb.mxu1 %v2633_v27 }
 0x273   :  { %1121 = vmatpush.msrb.mxu2 %v2636_v28  ;;  %1141 = vmatpush.msrb.mxu3 %v2639_v29 }
 0x274   :  { %1082 = vmatpush.msra.mxu0 %v2642_v31  ;;  %1102 = vmatpush.msrb.mxu1 %v2645_v32 }
 0x275   :  { %1122 = vmatpush.msrb.mxu2 %v2744_v45  ;;  %1142 = vmatpush.msrb.mxu3 %v3182_v33 }
 0x276   :  { %1083 = vmatpush.msra.mxu0 %v3183_v37  ;;  %1103 = vmatpush.msrb.mxu1 %v3184_v41 }
 0x277   :  { %1123 = vmatpush.msrb.mxu2 %v2750_v50  ;;  %1143 = vmatpush.msrb.mxu3 %v3186_v15 }
 0x278   :  { %1084 = vmatpush.msra.mxu0 %v3187_v36  ;;  %1104 = vmatpush.msrb.mxu1 %v3188_v46 }
 0x279   :  { %1124 = vmatpush.msrb.mxu2 %v2756_v53  ;;  %1144 = vmatpush.msrb.mxu3 %v3190_v49 }
 0x27a   :  { %1085 = vmatpush.msra.mxu0 %v3191_v38  ;;  %1105 = vmatpush.msrb.mxu1 %v3192_v42 }
 0x27b   :  { %1125 = vmatpush.msrb.mxu2 %v2762_v56  ;;  %1145 = vmatpush.msrb.mxu3 %v2765_v40 }
 0x27c   :  { %1086 = vmatpush.msra.mxu0 %v3195_v43  ;;  %1106 = vmatpush.msrb.mxu1 %v2769_v44  ;;  %v3208_v44 = vld [vmem:[#allocation51_spill] sm:$0xff] }
 0x27d   :  { %1126 = vmatpush.msrb.mxu2 %v2772_v54  ;;  %1146 = vmatpush.msrb.mxu3 %v2775_v47  ;;  %v3207_v47 = vld [vmem:[#allocation46_spill] sm:$0xff] }
 0x27e   :  { %1087 = vmatpush.msra.mxu0 %v3199_v30  ;;  %1107 = vmatpush.msrb.mxu1 %v2779_v39  ;;  %v2795_v30 = vld [vmem:[#allocation5 + $0x18] sm:$0xff] }
 0x27f   :  { %1127 = vmatpush.msrb.mxu2 %v2782_v58  ;;  %1147 = vmatpush.msrb.mxu3 %v2785_v34  ;;  %3206 = vst [vmem:[#allocation37_spill] sm:$0xff] %v2795_v30 }
 0x280   :  { %1088 = vmatpush.msra.mxu0 %v3203_v52  ;;  %1108 = vmatpush.msrb.mxu1 %v2789_v51  ;;  %v3209_v51 = vld [vmem:[#allocation53_spill] sm:$0xff] }
 0x281   :  { %1128 = vmatpush.msrb.mxu2 %v2792_v55  ;;  %1148 = vmatpush.msrb.mxu3 %v2795_v30 }
 0x2dd   :  { %v804_v39 = vpop.f32.mrf.mxu0  ;;  %v824_v58 = vpop.f32.mrf.mxu1 }
 0x2de   :  { %v805_v54 = vadd.f32 %v804_v39, %v3207_v47  ;;  %v825_v34 = vadd.f32 %v824_v58, %v3208_v44  ;;  %v3210_v44 = vld [vmem:[#allocation52_spill] sm:$0xff] }
 0x2e0   :  { %v1602_v43 = vmul.f32 -1.442695, %v805_v54  ;;  %v1603_v52 = vmul.f32 -1.442695, %v825_v34 }
 0x2e2   :  { %1687 = vpow2.f32 %v1602_v43 }
 0x2e3   :  { %1689 = vpow2.f32 %v1603_v52 }
 0x2e4   :  { %v864_v40 = vpop.f32.mrf.mxu3  ;;  %v844_v30 = vpop.f32.mrf.mxu2 }
 0x2e5   :  { %v865_v56 = vadd.f32 %v864_v40, %v3209_v51  ;;  %v845_v54 = vadd.f32 %v844_v30, %v3210_v44 }
 0x2e7   :  { %v1604_v42 = vmul.f32 -1.442695, %v865_v56 }
 0x2e8   :  { %v1688_v38 = vpop.eup %1687 }
 0x2e9   :  { %v1690_v55 = vpop.eup %1689  ;;  %v870_v49 = vadd.f32 1.0, %v1688_v38  ;;  %1691 = vpow2.f32 %v1604_v42 }
 0x2ea   :  { %v889_v53 = vadd.f32 1.0, %v1690_v55 }
 0x2eb   :  { %1693 = vrcp.f32 %v870_v49  ;;  %v882_v56 = vand.u32 2147483648, %v870_v49  ;;  %v880_v42 = vand.u32 2147483647, %v870_v49  ;;  %vm876_vm7 = vweird.f32 %v870_v49 }
 0x2ec   :  { %1695 = vrcp.f32 %v889_v53  ;;  %v901_v51 = vand.u32 2147483648, %v889_v53  ;;  %v899_v36 = vand.u32 2147483647, %v889_v53  ;;  %vm895_vm8 = vweird.f32 %v889_v53 }
 0x2ed   :  { %v883_v30 = vor.u32 1.1754944e-38, %v882_v56  ;;  %vm881_vm11 = vcmp.eq.f32.partialorder %v880_v42, 8.507059e+37 }
 0x2ee   :  { %vm900_vm12 = vcmp.eq.f32.partialorder %v899_v36, 8.507059e+37 }
 0x2ef   :  { %v1692_v46 = vpop.eup %1691 }
 0x2f0   :  { %v909_v47 = vadd.f32 1.0, %v1692_v46 }
 0x2f1   :  { %v1694_v39 = vpop.eup %1693 }
 0x2f2   :  { %v1696_v58 = vpop.eup %1695  ;;  %v872_v43 = vmul.f32 %v1694_v39, %v870_v49  ;;  %1697 = vrcp.f32 %v909_v47  ;;  %vm877_vm5 = vweird.f32 %v1694_v39  ;;  %v921_v56 = vand.u32 2147483648, %v909_v47 }
 0x2f3   :  { %v891_v34 = vmul.f32 %v1696_v58, %v889_v53  ;;  %1699 = vtanh.f32 %v845_v54  ;;  %vm896_vm6 = vweird.f32 %v1696_v58  ;;  %vm878_vm9 = vmor %vm876_vm7, %vm877_vm5  ;;  %vm915_vm14 = vweird.f32 %v909_v47 }
 0x2f4   :  { %v873_v52 = vsub.f32 1.0, %v872_v43  ;;  %vm897_vm10 = vmor %vm895_vm8, %vm896_vm6  ;;  %v902_v43 = vor.u32 1.1754944e-38, %v901_v51  ;;  %v922_v42 = vor.u32 1.1754944e-38, %v921_v56  ;;  %v3229_v56 = vld [vmem:[#allocation15_spill] sm:$0xff] }
 0x2f5   :  { %v892_v40 = vsub.f32 1.0, %v891_v34 }
 0x2f6   :  { %v874_v38 = vmul.f32 %v1694_v39, %v873_v52 }
 0x2f7   :  { %v893_v55 = vmul.f32 %v1696_v58, %v892_v40 }
 0x2f8   :  { %v1698_v15 = vpop.eup %1697  ;;  %v875_v46 = vadd.f32 %v1694_v39, %v874_v38 }
 0x2f9   :  { %v894_v44 = vadd.f32 %v1696_v58, %v893_v55  ;;  %v911_v50 = vmul.f32 %v1698_v15, %v909_v47  ;;  %v1700_v54 = vpop.eup %1699  ;;  %vm916_vm13 = vweird.f32 %v1698_v15  ;;  %v3218_v55 = vld [vmem:[#allocation20_spill] sm:$0xff] }
 0x2fa   :  { %v879_v34 = vsel %vm878_vm9, %v1694_v39, %v875_v46  ;;  %v919_v39 = vand.u32 2147483647, %v909_v47  ;;  %vm917_vm15 = vmor %vm915_vm14, %vm916_vm13  ;;  %v3217_v47 = vld [vmem:[#allocation26_spill] sm:$0xff] }
 0x2fb   :  { %v884_v41 = vsel %vm881_vm11, %v883_v30, %v879_v34  ;;  %v898_v52 = vsel %vm897_vm10, %v1696_v58, %v894_v44  ;;  %v912_v37 = vsub.f32 1.0, %v911_v50  ;;  %v3219_v46 = vld [vmem:[#allocation18_spill] sm:$0xff]  ;;  %v3221_v44 = vld [vmem:[#allocation19_spill] sm:$0xff] }
 0x2fc   :  { %v903_v40 = vsel %vm900_vm12, %v902_v43, %v898_v52  ;;  %v926_v33 = vmul.f32 %v1700_v54, %v884_v41  ;;  %vm920_vm0 = vcmp.eq.f32.partialorder %v919_v39, 8.507059e+37  ;;  %v3215_v41 = vld [vmem:[#allocation28_spill] sm:$0xff]  ;;  %v3220_v30 = vld [vmem:[#allocation14_spill] sm:$0xff]  ;;  %v3222_v43 = vld [vmem:[#allocation29_spill] sm:$0xff] }
 0x2fd   :  { %v925_v45 = vmul.f32 %v903_v40, %v2703_v26  ;;  %v913_v38 = vmul.f32 %v1698_v15, %v912_v37  ;;  %v3211_v26 = vld [vmem:[#allocation32_spill] sm:$0xff]  ;;  %v3214_v37 = vld [vmem:[#allocation13_spill] sm:$0xff]  ;;  %v3223_v34 = vld [vmem:[#allocation27_spill] sm:$0xff] }
 0x2fe   :  { %v3224_v54 = vld [vmem:[#allocation35_spill] sm:$0xff]  ;;  %v3225_v52 = vld [vmem:[#allocation24_spill] sm:$0xff] }
 0x2ff   :  { %v2803_v49 = vadd.f32 %v926_v33, %v925_v45  ;;  %v914_v53 = vadd.f32 %v1698_v15, %v913_v38  ;;  %v3212_v45 = vld [vmem:[#allocation22_spill] sm:$0xff]  ;;  %v3213_v33 = vld [vmem:[#allocation17_spill] sm:$0xff]  ;;  %v3226_v40 = vld [vmem:[#allocation31_spill] sm:$0xff] }
 0x300   :  { %v3227_v38 = vld [vmem:[#allocation21_spill] sm:$0xff]  ;;  %v3230_v39 = vld [vmem:[#allocation36_spill] sm:$0xff] }
 0x301   :  { %1701 = vtanh.f32 %v2803_v49  ;;  %v918_v51 = vsel %vm917_vm15, %v1698_v15, %v914_v53  ;;  %v3216_v15 = vld [vmem:[#allocation16_spill] sm:$0xff]  ;;  %v3228_v53 = vld [vmem:[#allocation30_spill] sm:$0xff] }
 0x302   :  { %v923_v50 = vsel %vm920_vm0, %v922_v42, %v918_v51  ;;  %v3231_v51 = vld [vmem:[#allocation34_spill] sm:$0xff]  ;;  %v3232_v42 = vld [vmem:[#allocation25_spill] sm:$0xff] }
 0x307   :  { %v1702_v36 = vpop.eup %1701 }
 0x308   :  { %v929_v58 = vmul.f32 %v1702_v36, %v923_v50  ;;  %v3233_v36 = vld [vmem:[#allocation23_spill] sm:$0xff]  ;;  %v3234_v50 = vld [vmem:[#allocation33_spill] sm:$0xff] }
 0x30a   :  { %946 = vmatmul.f32.vlgmr.msrb.gmra.mxu0 %v929_v58  ;;  %966 = vmatmul.f32.vlgmr.msra.gmra.mxu1 %v929_v58 }
 0x30b   :  { %986 = vmatmul.f32.vlgmr.msra.gmra.mxu2 %v929_v58  ;;  %1006 = vmatmul.f32.vlgmr.msra.gmra.mxu3 %v929_v58  ;;  %v3235_v58 = vld [vmem:[#allocation38_spill] sm:$0xff] }
 0x30c   :  { %1216 = vmatpush.msrb.mxu0 %v2534_v1  ;;  %1236 = vmatpush.msra.mxu1 %v2537_v59 }
 0x30d   :  { %1256 = vmatpush.msra.mxu2 %v2540_v60  ;;  %1276 = vmatpush.msra.mxu3 %v2543_v62 }
 0x30e   :  { %1217 = vmatpush.msrb.mxu0 %v2546_v3  ;;  %1237 = vmatpush.msra.mxu1 %v2549_v10 }
 0x30f   :  { %1257 = vmatpush.msra.mxu2 %v2552_v5  ;;  %1277 = vmatpush.msra.mxu3 %v2555_v22 }
 0x310   :  { %1218 = vmatpush.msrb.mxu0 %v2558_v48  ;;  %1238 = vmatpush.msra.mxu1 %v2561_v13 }
 0x311   :  { %1258 = vmatpush.msra.mxu2 %v2564_v8  ;;  %1278 = vmatpush.msra.mxu3 %v2567_v7 }
 0x312   :  { %1219 = vmatpush.msrb.mxu0 %v2570_v12  ;;  %1239 = vmatpush.msra.mxu1 %v2573_v20 }
 0x313   :  { %1259 = vmatpush.msra.mxu2 %v2576_v35  ;;  %1279 = vmatpush.msra.mxu3 %v2579_v14 }
 0x314   :  { %1220 = vmatpush.msrb.mxu0 %v2582_v18  ;;  %1240 = vmatpush.msra.mxu1 %v2585_v57 }
 0x315   :  { %1260 = vmatpush.msra.mxu2 %v2588_v0  ;;  %1280 = vmatpush.msra.mxu3 %v2591_v9 }
 0x316   :  { %1221 = vmatpush.msrb.mxu0 %v2594_v63  ;;  %1241 = vmatpush.msra.mxu1 %v2597_v21 }
 0x317   :  { %1261 = vmatpush.msra.mxu2 %v2600_v17  ;;  %1281 = vmatpush.msra.mxu3 %v2603_v23 }
 0x318   :  { %1222 = vmatpush.msrb.mxu0 %v2606_v11  ;;  %1242 = vmatpush.msra.mxu1 %v2609_v61 }
 0x319   :  { %1262 = vmatpush.msra.mxu2 %v2612_v6  ;;  %1282 = vmatpush.msra.mxu3 %v2615_v4 }
 0x31a   :  { %1223 = vmatpush.msrb.mxu0 %v2618_v2  ;;  %1243 = vmatpush.msra.mxu1 %v2621_v16 }
 0x31b   :  { %1263 = vmatpush.msra.mxu2 %v2624_v19  ;;  %1283 = vmatpush.msra.mxu3 %v2627_v24 }
 0x31c   :  { %1224 = vmatpush.msrb.mxu0 %v2630_v25  ;;  %1244 = vmatpush.msra.mxu1 %v2633_v27 }
 0x31d   :  { %1264 = vmatpush.msra.mxu2 %v2636_v28  ;;  %1284 = vmatpush.msra.mxu3 %v2639_v29 }
 0x31e   :  { %1225 = vmatpush.msrb.mxu0 %v2642_v31  ;;  %1245 = vmatpush.msra.mxu1 %v2645_v32 }
 0x31f   :  { %1265 = vmatpush.msra.mxu2 %v3211_v26  ;;  %1285 = vmatpush.msra.mxu3 %v3212_v45 }
 0x320   :  { %1226 = vmatpush.msrb.mxu0 %v3213_v33  ;;  %1246 = vmatpush.msra.mxu1 %v3214_v37 }
 0x321   :  { %1266 = vmatpush.msra.mxu2 %v3215_v41  ;;  %1286 = vmatpush.msra.mxu3 %v3216_v15 }
 0x322   :  { %1227 = vmatpush.msrb.mxu0 %v3217_v47  ;;  %1247 = vmatpush.msra.mxu1 %v3218_v55 }
 0x323   :  { %1267 = vmatpush.msra.mxu2 %v3219_v46  ;;  %1287 = vmatpush.msra.mxu3 %v3220_v30 }
 0x324   :  { %1228 = vmatpush.msrb.mxu0 %v3221_v44  ;;  %1248 = vmatpush.msra.mxu1 %v3222_v43 }
 0x325   :  { %1268 = vmatpush.msra.mxu2 %v3223_v34  ;;  %1288 = vmatpush.msra.mxu3 %v3224_v54  ;;  %v3237_v54 = vld [vmem:[#allocation50_spill] sm:$0xff] }
 0x326   :  { %1229 = vmatpush.msrb.mxu0 %v3225_v52  ;;  %1249 = vmatpush.msra.mxu1 %v3226_v40  ;;  %v3236_v52 = vld [vmem:[#allocation37_spill] sm:$0xff]  ;;  %v3238_v34 = vld [vmem:[#allocation54_spill] sm:$0xff] }
 0x327   :  { %1269 = vmatpush.msra.mxu2 %v3227_v38  ;;  %1289 = vmatpush.msra.mxu3 %v3228_v53 }
 0x328   :  { %1230 = vmatpush.msrb.mxu0 %v3229_v56  ;;  %1250 = vmatpush.msra.mxu1 %v3230_v39 }
 0x329   :  { %1270 = vmatpush.msra.mxu2 %v3231_v51  ;;  %1290 = vmatpush.msra.mxu3 %v3232_v42  ;;  %v3239_v42 = vld [vmem:[#allocation56_spill] sm:$0xff] }
 0x32a   :  { %1231 = vmatpush.msrb.mxu0 %v3233_v36  ;;  %1251 = vmatpush.msra.mxu1 %v3234_v50 }
 0x32b   :  { %1271 = vmatpush.msra.mxu2 %v3235_v58  ;;  %1291 = vmatpush.msra.mxu3 %v3236_v52 }
 0x387   :  { %v947_v40 = vpop.f32.mrf.mxu0  ;;  %v967_v38 = vpop.f32.mrf.mxu1 }
 0x388   :  { %v948_v53 = vadd.f32 %v947_v40, %v3237_v54  ;;  %v968_v56 = vadd.f32 %v967_v38, %v3238_v34  ;;  %v3240_v34 = vld [vmem:[#allocation55_spill] sm:$0xff] }
 0x38a   :  { %v1605_v43 = vmul.f32 -1.442695, %v948_v53  ;;  %v1606_v39 = vmul.f32 -1.442695, %v968_v56 }
 0x38c   :  { %1703 = vpow2.f32 %v1605_v43 }
 0x38d   :  { %1705 = vpow2.f32 %v1606_v39 }
 0x38e   :  { %v1007_v51 = vpop.f32.mrf.mxu3  ;;  %v987_v52 = vpop.f32.mrf.mxu2 }
 0x38f   :  { %v1008_v44 = vadd.f32 %v1007_v51, %v3239_v42  ;;  %v988_v38 = vadd.f32 %v987_v52, %v3240_v34 }
 0x391   :  { %v1607_v36 = vmul.f32 -1.442695, %v1008_v44 }
 0x392   :  { %v1704_v30 = vpop.eup %1703 }
 0x393   :  { %v1706_v50 = vpop.eup %1705  ;;  %v1013_v46 = vadd.f32 1.0, %v1704_v30  ;;  %1707 = vpow2.f32 %v1607_v36 }
 0x394   :  { %v1032_v58 = vadd.f32 1.0, %v1706_v50 }
 0x395   :  { %1709 = vrcp.f32 %v1013_v46  ;;  %v1025_v44 = vand.u32 2147483648, %v1013_v46  ;;  %v1023_v36 = vand.u32 2147483647, %v1013_v46  ;;  %vm1019_vm3 = vweird.f32 %v1013_v46 }
 0x396   :  { %1711 = vrcp.f32 %v1032_v58  ;;  %v1044_v42 = vand.u32 2147483648, %v1032_v58  ;;  %v1042_v47 = vand.u32 2147483647, %v1032_v58  ;;  %vm1038_vm4 = vweird.f32 %v1032_v58 }
 0x397   :  { %v1026_v52 = vor.u32 1.1754944e-38, %v1025_v44  ;;  %vm1024_vm7 = vcmp.eq.f32.partialorder %v1023_v36, 8.507059e+37 }
 0x398   :  { %vm1043_vm8 = vcmp.eq.f32.partialorder %v1042_v47, 8.507059e+37 }
 0x399   :  { %v1708_v55 = vpop.eup %1707 }
 0x39a   :  { %v1052_v54 = vadd.f32 1.0, %v1708_v55 }
 0x39b   :  { %v1710_v40 = vpop.eup %1709 }
 0x39c   :  { %v1712_v53 = vpop.eup %1711  ;;  %v1015_v43 = vmul.f32 %v1710_v40, %v1013_v46  ;;  %1713 = vrcp.f32 %v1052_v54  ;;  %vm1020_vm1 = vweird.f32 %v1710_v40  ;;  %v1064_v44 = vand.u32 2147483648, %v1052_v54 }
 0x39d   :  { %v1034_v56 = vmul.f32 %v1712_v53, %v1032_v58  ;;  %1715 = vtanh.f32 %v988_v38  ;;  %vm1039_vm2 = vweird.f32 %v1712_v53  ;;  %vm1021_vm5 = vmor %vm1019_vm3, %vm1020_vm1  ;;  %vm1058_vm10 = vweird.f32 %v1052_v54 }
 0x39e   :  { %v1016_v39 = vsub.f32 1.0, %v1015_v43  ;;  %vm1040_vm6 = vmor %vm1038_vm4, %vm1039_vm2  ;;  %v1045_v43 = vor.u32 1.1754944e-38, %v1044_v42  ;;  %v1065_v36 = vor.u32 1.1754944e-38, %v1064_v44 }
 0x39f   :  { %v1035_v51 = vsub.f32 1.0, %v1034_v56 }
 0x3a0   :  { %v1017_v30 = vmul.f32 %v1710_v40, %v1016_v39 }
 0x3a1   :  { %v1036_v50 = vmul.f32 %v1712_v53, %v1035_v51 }
 0x3a2   :  { %v1714_v15 = vpop.eup %1713  ;;  %v1018_v55 = vadd.f32 %v1710_v40, %v1017_v30 }
 0x3a3   :  { %v1037_v34 = vadd.f32 %v1712_v53, %v1036_v50  ;;  %v1054_v41 = vmul.f32 %v1714_v15, %v1052_v54  ;;  %v1716_v38 = vpop.eup %1715  ;;  %vm1059_vm9 = vweird.f32 %v1714_v15 }
 0x3a4   :  { %v1022_v56 = vsel %vm1021_vm5, %v1710_v40, %v1018_v55  ;;  %v1062_v40 = vand.u32 2147483647, %v1052_v54  ;;  %vm1060_vm11 = vmor %vm1058_vm10, %vm1059_vm9  ;;  %v3270_v55 = vld [vmem:[#allocation58_spill] sm:$0xff] }
 0x3a5   :  { %v1027_v37 = vsel %vm1024_vm7, %v1026_v52, %v1022_v56  ;;  %v1041_v39 = vsel %vm1040_vm6, %v1712_v53, %v1037_v34  ;;  %v1055_v33 = vsub.f32 1.0, %v1054_v41 }
 0x3a6   :  { %v1046_v51 = vsel %vm1043_vm8, %v1045_v43, %v1041_v39  ;;  %v1069_v45 = vmul.f32 %v1716_v38, %v1027_v37  ;;  %vm1063_vm12 = vcmp.eq.f32.partialorder %v1062_v40, 8.507059e+37 }
 0x3a7   :  { %v1068_v26 = vmul.f32 %v1046_v51, %v2803_v49  ;;  %v1056_v30 = vmul.f32 %v1714_v15, %v1055_v33 }
 0x3a9   :  { %v2875_v46 = vadd.f32 %v1069_v45, %v1068_v26  ;;  %v1057_v58 = vadd.f32 %v1714_v15, %v1056_v30 }
 0x3ab   :  { %1717 = vtanh.f32 %v2875_v46  ;;  %v1061_v42 = vsel %vm1060_vm11, %v1714_v15, %v1057_v58 }
 0x3ac   :  { %v1066_v41 = vsel %vm1063_vm12, %v1065_v36, %v1061_v42 }
 0x3b1   :  { %v1718_v47 = vpop.eup %1717 }
 0x3b2   :  { %v1072_v53 = vmul.f32 %v1718_v47, %v1066_v41 }
 0x3b4   :  { %1089 = vmatmul.f32.vlgmr.msra.gmra.mxu0 %v1072_v53  ;;  %1109 = vmatmul.f32.vlgmr.msrb.gmra.mxu1 %v1072_v53 }
 0x3b5   :  { %1129 = vmatmul.f32.vlgmr.msrb.gmra.mxu2 %v1072_v53  ;;  %1149 = vmatmul.f32.vlgmr.msrb.gmra.mxu3 %v1072_v53 }
 0x3b6   :  { %1359 = vmatpush.msra.mxu0 %v2534_v1  ;;  %1379 = vmatpush.msrb.mxu1 %v2537_v59  ;;  %v3241_v1 = vld [vmem:[#allocation32_spill] sm:$0xff]  ;;  %v3242_v59 = vld [vmem:[#allocation22_spill] sm:$0xff] }
 0x3b7   :  { %1399 = vmatpush.msrb.mxu2 %v2540_v60  ;;  %1419 = vmatpush.msrb.mxu3 %v2543_v62  ;;  %v3243_v60 = vld [vmem:[#allocation17_spill] sm:$0xff] }
 0x3b8   :  { %1360 = vmatpush.msra.mxu0 %v2546_v3  ;;  %1380 = vmatpush.msrb.mxu1 %v2549_v10  ;;  %v3244_v62 = vld [vmem:[#allocation13_spill] sm:$0xff]  ;;  %v3245_v3 = vld [vmem:[#allocation28_spill] sm:$0xff] }
 0x3b9   :  { %1400 = vmatpush.msrb.mxu2 %v2552_v5  ;;  %1420 = vmatpush.msrb.mxu3 %v2555_v22  ;;  %v3246_v10 = vld [vmem:[#allocation16_spill] sm:$0xff]  ;;  %v3247_v5 = vld [vmem:[#allocation26_spill] sm:$0xff] }
 0x3ba   :  { %1361 = vmatpush.msra.mxu0 %v2558_v48  ;;  %1381 = vmatpush.msrb.mxu1 %v2561_v13  ;;  %v3248_v22 = vld [vmem:[#allocation20_spill] sm:$0xff]  ;;  %v3249_v48 = vld [vmem:[#allocation18_spill] sm:$0xff] }
 0x3bb   :  { %1401 = vmatpush.msrb.mxu2 %v2564_v8  ;;  %1421 = vmatpush.msrb.mxu3 %v2567_v7  ;;  %v3250_v13 = vld [vmem:[#allocation14_spill] sm:$0xff]  ;;  %v3251_v8 = vld [vmem:[#allocation19_spill] sm:$0xff]  ;;  %v3252_v7 = vld [vmem:[#allocation29_spill] sm:$0xff] }
 0x3bc   :  { %1362 = vmatpush.msra.mxu0 %v2570_v12  ;;  %1382 = vmatpush.msrb.mxu1 %v2573_v20  ;;  %v3253_v12 = vld [vmem:[#allocation27_spill] sm:$0xff] }
 0x3bd   :  { %1402 = vmatpush.msrb.mxu2 %v2576_v35  ;;  %1422 = vmatpush.msrb.mxu3 %v2579_v14  ;;  %v3254_v20 = vld [vmem:[#allocation35_spill] sm:$0xff]  ;;  %v3255_v35 = vld [vmem:[#allocation24_spill] sm:$0xff] }
 0x3be   :  { %1363 = vmatpush.msra.mxu0 %v2582_v18  ;;  %1383 = vmatpush.msrb.mxu1 %v2585_v57  ;;  %v3256_v14 = vld [vmem:[#allocation31_spill] sm:$0xff]  ;;  %v3257_v18 = vld [vmem:[#allocation21_spill] sm:$0xff]  ;;  %v3258_v57 = vld [vmem:[#allocation30_spill] sm:$0xff] }
 0x3bf   :  { %1403 = vmatpush.msrb.mxu2 %v2588_v0  ;;  %1423 = vmatpush.msrb.mxu3 %v2591_v9  ;;  %v3259_v0 = vld [vmem:[#allocation15_spill] sm:$0xff]  ;;  %v3260_v9 = vld [vmem:[#allocation36_spill] sm:$0xff] }
 0x3c0   :  { %1364 = vmatpush.msra.mxu0 %v2594_v63  ;;  %1384 = vmatpush.msrb.mxu1 %v2597_v21  ;;  %v3261_v63 = vld [vmem:[#allocation34_spill] sm:$0xff]  ;;  %v3262_v21 = vld [vmem:[#allocation25_spill] sm:$0xff] }
 0x3c1   :  { %1404 = vmatpush.msrb.mxu2 %v2600_v17  ;;  %1424 = vmatpush.msrb.mxu3 %v2603_v23  ;;  %v3263_v17 = vld [vmem:[#allocation23_spill] sm:$0xff]  ;;  %v3264_v23 = vld [vmem:[#allocation33_spill] sm:$0xff] }
 0x3c2   :  { %1365 = vmatpush.msra.mxu0 %v2606_v11  ;;  %1385 = vmatpush.msrb.mxu1 %v2609_v61  ;;  %v3265_v11 = vld [vmem:[#allocation38_spill] sm:$0xff]  ;;  %v3266_v61 = vld [vmem:[#allocation37_spill] sm:$0xff] }
 0x3c3   :  { %1405 = vmatpush.msrb.mxu2 %v2612_v6  ;;  %1425 = vmatpush.msrb.mxu3 %v2615_v4 }
 0x3c4   :  { %1366 = vmatpush.msra.mxu0 %v2618_v2  ;;  %1386 = vmatpush.msrb.mxu1 %v2621_v16  ;;  %v3267_v2 = vld [vmem:[#allocation12_spill] sm:$0xff] }
 0x3c5   :  { %1406 = vmatpush.msrb.mxu2 %v2624_v19  ;;  %1426 = vmatpush.msrb.mxu3 %v2627_v24  ;;  %v3268_v19 = vld [vmem:[#allocation57_spill] sm:$0xff] }
 0x3c6   :  { %1367 = vmatpush.msra.mxu0 %v2630_v25  ;;  %1387 = vmatpush.msrb.mxu1 %v2633_v27 }
 0x3c7   :  { %1407 = vmatpush.msrb.mxu2 %v2636_v28  ;;  %1427 = vmatpush.msrb.mxu3 %v2639_v29  ;;  %v3269_v29 = vld [vmem:[#allocation59_spill] sm:$0xff] }
 0x3c8   :  { %1368 = vmatpush.msra.mxu0 %v2642_v31  ;;  %1388 = vmatpush.msrb.mxu1 %v2645_v32 }
 0x3c9   :  { %1408 = vmatpush.msrb.mxu2 %v3241_v1  ;;  %1428 = vmatpush.msrb.mxu3 %v3242_v59 }
 0x3ca   :  { %1369 = vmatpush.msra.mxu0 %v3243_v60  ;;  %1389 = vmatpush.msrb.mxu1 %v3244_v62 }
 0x3cb   :  { %1409 = vmatpush.msrb.mxu2 %v3245_v3  ;;  %1429 = vmatpush.msrb.mxu3 %v3246_v10 }
 0x3cc   :  { %1370 = vmatpush.msra.mxu0 %v3247_v5  ;;  %1390 = vmatpush.msrb.mxu1 %v3248_v22 }
 0x3cd   :  { %1410 = vmatpush.msrb.mxu2 %v3249_v48  ;;  %1430 = vmatpush.msrb.mxu3 %v3250_v13 }
 0x3ce   :  { %1371 = vmatpush.msra.mxu0 %v3251_v8  ;;  %1391 = vmatpush.msrb.mxu1 %v3252_v7 }
 0x3cf   :  { %1411 = vmatpush.msrb.mxu2 %v3253_v12  ;;  %1431 = vmatpush.msrb.mxu3 %v3254_v20 }
 0x3d0   :  { %1372 = vmatpush.msra.mxu0 %v3255_v35  ;;  %1392 = vmatpush.msrb.mxu1 %v3256_v14 }
 0x3d1   :  { %1412 = vmatpush.msrb.mxu2 %v3257_v18  ;;  %1432 = vmatpush.msrb.mxu3 %v3258_v57 }
 0x3d2   :  { %1373 = vmatpush.msra.mxu0 %v3259_v0  ;;  %1393 = vmatpush.msrb.mxu1 %v3260_v9 }
 0x3d3   :  { %1413 = vmatpush.msrb.mxu2 %v3261_v63  ;;  %1433 = vmatpush.msrb.mxu3 %v3262_v21  ;;  %v3271_v21 = vld [vmem:[#allocation39_spill] sm:$0xff] }
 0x3d4   :  { %1374 = vmatpush.msra.mxu0 %v3263_v17  ;;  %1394 = vmatpush.msrb.mxu1 %v3264_v23  ;;  %v3272_v23 = vld [vmem:[#allocation60_spill] sm:$0xff] }
 0x3d5   :  { %1414 = vmatpush.msrb.mxu2 %v3265_v11  ;;  %1434 = vmatpush.msrb.mxu3 %v3266_v61 }
 0x431   :  { %v1090_v6 = vpop.f32.mrf.mxu0  ;;  %v1110_v4 = vpop.f32.mrf.mxu1 }
 0x432   :  { %v1091_v16 = vadd.f32 %v1090_v6, %v3267_v2  ;;  %v1111_v24 = vadd.f32 %v1110_v4, %v3268_v19  ;;  %v3273_v2 = vld [vmem:[#allocation62_spill] sm:$0xff] }
 0x434   :  { %v1608_v25 = vmul.f32 -1.442695, %v1091_v16  ;;  %v1609_v27 = vmul.f32 -1.442695, %v1111_v24 }
 0x436   :  { %1719 = vpow2.f32 %v1608_v25 }
 0x437   :  { %1721 = vpow2.f32 %v1609_v27 }
 0x438   :  { %v1150_v28 = vpop.f32.mrf.mxu3  ;;  %v1130_v37 = vpop.f32.mrf.mxu2 }
 0x439   :  { %v1151_v31 = vadd.f32 %v1150_v28, %v3269_v29  ;;  %v1131_v52 = vadd.f32 %v1130_v37, %v3270_v55 }
 0x43b   :  { %v1610_v32 = vmul.f32 -1.442695, %v1151_v31 }
 0x43c   :  { %v1720_v49 = vpop.eup %1719 }
 0x43d   :  { %v1722_v26 = vpop.eup %1721  ;;  %v1156_v45 = vadd.f32 1.0, %v1720_v49  ;;  %1723 = vpow2.f32 %v1610_v32 }
 0x43e   :  { %v1175_v33 = vadd.f32 1.0, %v1722_v26  ;;  %v3274_v26 = vld [vmem:[#allocation61_spill] sm:$0xff] }
 0x43f   :  { %1725 = vrcp.f32 %v1156_v45  ;;  %v1168_v51 = vand.u32 2147483648, %v1156_v45  ;;  %v1166_v44 = vand.u32 2147483647, %v1156_v45  ;;  %vm1162_vm15 = vweird.f32 %v1156_v45 }
 0x440   :  { %1727 = vrcp.f32 %v1175_v33  ;;  %v1187_v30 = vand.u32 2147483648, %v1175_v33  ;;  %v1185_v42 = vand.u32 2147483647, %v1175_v33  ;;  %vm1181_vm0 = vweird.f32 %v1175_v33 }
 0x441   :  { %v1169_v41 = vor.u32 1.1754944e-38, %v1168_v51  ;;  %vm1167_vm3 = vcmp.eq.f32.partialorder %v1166_v44, 8.507059e+37 }
 0x442   :  { %v1188_v59 = vor.u32 1.1754944e-38, %v1187_v30  ;;  %vm1186_vm4 = vcmp.eq.f32.partialorder %v1185_v42, 8.507059e+37 }
 0x443   :  { %v1724_v15 = vpop.eup %1723 }
 0x444   :  { %v1195_v54 = vadd.f32 1.0, %v1724_v15 }
 0x445   :  { %v1726_v50 = vpop.eup %1725 }
 0x446   :  { %v1728_v34 = vpop.eup %1727  ;;  %v1158_v43 = vmul.f32 %v1726_v50, %v1156_v45  ;;  %1729 = vrcp.f32 %v1195_v54  ;;  %vm1163_vm13 = vweird.f32 %v1726_v50  ;;  %v1207_v20 = vand.u32 2147483648, %v1195_v54 }
 0x447   :  { %v1177_v56 = vmul.f32 %v1728_v34, %v1175_v33  ;;  %1731 = vtanh.f32 %v1131_v52  ;;  %vm1182_vm14 = vweird.f32 %v1728_v34  ;;  %vm1164_vm1 = vmor %vm1162_vm15, %vm1163_vm13  ;;  %vm1201_vm6 = vweird.f32 %v1195_v54 }
 0x448   :  { %v1159_v38 = vsub.f32 1.0, %v1158_v43  ;;  %vm1183_vm2 = vmor %vm1181_vm0, %vm1182_vm14  ;;  %v1205_v35 = vand.u32 2147483647, %v1195_v54  ;;  %v1208_v18 = vor.u32 1.1754944e-38, %v1207_v20 }
 0x449   :  { %v1178_v39 = vsub.f32 1.0, %v1177_v56 }
 0x44a   :  { %v1160_v58 = vmul.f32 %v1726_v50, %v1159_v38  ;;  %vm1206_vm8 = vcmp.eq.f32.partialorder %v1205_v35, 8.507059e+37  ;;  %v1516_v35 = vld [vmem:[#allocation7 + $0x70] sm:$0xff] }
 0x44b   :  { %v1179_v40 = vmul.f32 %v1728_v34, %v1178_v39 }
 0x44c   :  { %v1730_v36 = vpop.eup %1729  ;;  %v1161_v47 = vadd.f32 %v1726_v50, %v1160_v58 }
 0x44d   :  { %v1180_v53 = vadd.f32 %v1728_v34, %v1179_v40  ;;  %v1197_v1 = vmul.f32 %v1730_v36, %v1195_v54  ;;  %v1732_v62 = vpop.eup %1731  ;;  %vm1202_vm5 = vweird.f32 %v1730_v36 }
 0x44e   :  { %v1165_v60 = vsel %vm1164_vm1, %v1726_v50, %v1161_v47  ;;  %vm1203_vm7 = vmor %vm1201_vm6, %vm1202_vm5 }
 0x44f   :  { %v1170_v3 = vsel %vm1167_vm3, %v1169_v41, %v1165_v60  ;;  %v1184_v10 = vsel %vm1183_vm2, %v1728_v34, %v1180_v53  ;;  %v1198_v5 = vsub.f32 1.0, %v1197_v1 }
 0x450   :  { %v1189_v22 = vsel %vm1186_vm4, %v1188_v59, %v1184_v10  ;;  %v1212_v48 = vmul.f32 %v1732_v62, %v1170_v3 }
 0x451   :  { %v1211_v13 = vmul.f32 %v1189_v22, %v2875_v46  ;;  %v1199_v8 = vmul.f32 %v1730_v36, %v1198_v5 }
 0x453   :  { %v2947_v7 = vadd.f32 %v1212_v48, %v1211_v13  ;;  %v1200_v12 = vadd.f32 %v1730_v36, %v1199_v8 }
 0x455   :  { %1733 = vtanh.f32 %v2947_v7  ;;  %v1204_v14 = vsel %vm1203_vm7, %v1730_v36, %v1200_v12 }
 0x456   :  { %v1209_v0 = vsel %vm1206_vm8, %v1208_v18, %v1204_v14  ;;  %v1515_v14 = vld [vmem:[#allocation7 + $0x68] sm:$0xff]  ;;  %v1514_v18 = vld [vmem:[#allocation7 + $0x60] sm:$0xff] }
 0x45b   :  { %v1734_v57 = vpop.eup %1733 }
 0x45c   :  { %v1215_v9 = vmul.f32 %v1734_v57, %v1209_v0  ;;  %v1513_v57 = vld [vmem:[#allocation7 + $0x58] sm:$0xff]  ;;  %v1512_v0 = vld [vmem:[#allocation7 + $0x50] sm:$0xff] }
 0x45e   :  { %1232 = vmatmul.f32.vlgmr.msrb.gmra.mxu0 %v1215_v9  ;;  %1252 = vmatmul.f32.vlgmr.msra.gmra.mxu1 %v1215_v9 }
 0x45f   :  { %1272 = vmatmul.f32.vlgmr.msra.gmra.mxu2 %v1215_v9  ;;  %1292 = vmatmul.f32.vlgmr.msra.gmra.mxu3 %v1215_v9  ;;  %v1511_v9 = vld [vmem:[#allocation7 + $0x48] sm:$0xff] }
 0x4db   :  { %v1233_v46 = vpop.f32.mrf.mxu0  ;;  %v1253_v63 = vpop.f32.mrf.mxu1 }
 0x4dc   :  { %v1234_v17 = vadd.f32 %v1233_v46, %v3271_v21  ;;  %v1254_v11 = vadd.f32 %v1253_v63, %v3272_v23  ;;  %v1510_v46 = vld [vmem:[#allocation7 + $0x40] sm:$0xff]  ;;  %v1509_v63 = vld [vmem:[#allocation7 + $0x38] sm:$0xff]  ;;  %v1508_v21 = vld [vmem:[#allocation7 + $0x30] sm:$0xff] }
 0x4de   :  { %v1611_v61 = vmul.f32 -1.442695, %v1234_v17  ;;  %v1612_v6 = vmul.f32 -1.442695, %v1254_v11  ;;  %v3275_v11 = vld [vmem:[#allocation40_spill] sm:$0xff] }
 0x4e0   :  { %1735 = vpow2.f32 %v1611_v61 }
 0x4e1   :  { %1737 = vpow2.f32 %v1612_v6  ;;  %v3276_v6 = vld [vmem:[#allocation63_spill] sm:$0xff] }
 0x4e2   :  { %v1293_v4 = vpop.f32.mrf.mxu3  ;;  %v1273_v29 = vpop.f32.mrf.mxu2 }
 0x4e3   :  { %v1294_v16 = vadd.f32 %v1293_v4, %v3273_v2  ;;  %v1274_v45 = vadd.f32 %v1273_v29, %v3274_v26  ;;  %v1507_v2 = vld [vmem:[#allocation7 + $0x28] sm:$0xff] }
 0x4e4   :  { %v1503_v29 = vld [vmem:[#allocation7 + $0x8] sm:$0xff] }
 0x4e5   :  { %v1613_v19 = vmul.f32 -1.442695, %v1294_v16 }
 0x4e6   :  { %v1736_v24 = vpop.eup %1735 }
 0x4e7   :  { %v1738_v25 = vpop.eup %1737  ;;  %v1299_v27 = vadd.f32 1.0, %v1736_v24  ;;  %1739 = vpow2.f32 %v1613_v19  ;;  %v1506_v24 = vld [vmem:[#allocation7 + $0x20] sm:$0xff] }
 0x4e8   :  { %v1318_v28 = vadd.f32 1.0, %v1738_v25  ;;  %v1505_v25 = vld [vmem:[#allocation7 + $0x18] sm:$0xff] }
 0x4e9   :  { %1741 = vrcp.f32 %v1299_v27  ;;  %v1311_v55 = vand.u32 2147483648, %v1299_v27  ;;  %v1309_v43 = vand.u32 2147483647, %v1299_v27  ;;  %vm1305_vm11 = vweird.f32 %v1299_v27 }
 0x4ea   :  { %1743 = vrcp.f32 %v1318_v28  ;;  %v1330_v52 = vand.u32 2147483648, %v1318_v28  ;;  %v1328_v38 = vand.u32 2147483647, %v1318_v28  ;;  %vm1324_vm12 = vweird.f32 %v1318_v28 }
 0x4eb   :  { %v1312_v30 = vor.u32 1.1754944e-38, %v1311_v55  ;;  %vm1310_vm15 = vcmp.eq.f32.partialorder %v1309_v43, 8.507059e+37 }
 0x4ec   :  { %v1331_v40 = vor.u32 1.1754944e-38, %v1330_v52  ;;  %vm1329_vm0 = vcmp.eq.f32.partialorder %v1328_v38, 8.507059e+37 }
 0x4ed   :  { %v1740_v31 = vpop.eup %1739 }
 0x4ee   :  { %v1338_v32 = vadd.f32 1.0, %v1740_v31  ;;  %v3277_v31 = vld [vmem:[#allocation65_spill] sm:$0xff] }
 0x4ef   :  { %v1742_v49 = vpop.eup %1741 }
 0x4f0   :  { %v1744_v33 = vpop.eup %1743  ;;  %v1301_v37 = vmul.f32 %v1742_v49, %v1299_v27  ;;  %1745 = vrcp.f32 %v1338_v32  ;;  %vm1306_vm9 = vweird.f32 %v1742_v49  ;;  %v1350_v5 = vand.u32 2147483648, %v1338_v32  ;;  %v1504_v27 = vld [vmem:[#allocation7 + $0x10] sm:$0xff] }
 0x4f1   :  { %v1320_v15 = vmul.f32 %v1744_v33, %v1318_v28  ;;  %1747 = vtanh.f32 %v1274_v45  ;;  %vm1325_vm10 = vweird.f32 %v1744_v33  ;;  %vm1307_vm13 = vmor %vm1305_vm11, %vm1306_vm9  ;;  %vm1344_vm2 = vweird.f32 %v1338_v32 }
 0x4f2   :  { %v1302_v54 = vsub.f32 1.0, %v1301_v37  ;;  %vm1326_vm14 = vmor %vm1324_vm12, %vm1325_vm10  ;;  %v1348_v22 = vand.u32 2147483647, %v1338_v32  ;;  %v1351_v13 = vor.u32 1.1754944e-38, %v1350_v5 }
 0x4f3   :  { %v1321_v50 = vsub.f32 1.0, %v1320_v15 }
 0x4f4   :  { %v1303_v34 = vmul.f32 %v1742_v49, %v1302_v54  ;;  %vm1349_vm4 = vcmp.eq.f32.partialorder %v1348_v22, 8.507059e+37 }
 0x4f5   :  { %v1322_v56 = vmul.f32 %v1744_v33, %v1321_v50 }
 0x4f6   :  { %v1746_v39 = vpop.eup %1745  ;;  %v1304_v51 = vadd.f32 %v1742_v49, %v1303_v34  ;;  %v3278_v34 = vld [vmem:[#allocation64_spill] sm:$0xff] }
 0x4f7   :  { %v1323_v58 = vadd.f32 %v1744_v33, %v1322_v56  ;;  %v1340_v44 = vmul.f32 %v1746_v39, %v1338_v32  ;;  %v1748_v36 = vpop.eup %1747  ;;  %vm1345_vm1 = vweird.f32 %v1746_v39 }
 0x4f8   :  { %v1308_v42 = vsel %vm1307_vm13, %v1742_v49, %v1304_v51  ;;  %vm1346_vm3 = vmor %vm1344_vm2, %vm1345_vm1  ;;  %v1502_v49 = vld [vmem:[#allocation7] sm:$0xff] }
 0x4f9   :  { %v1313_v47 = vsel %vm1310_vm15, %v1312_v30, %v1308_v42  ;;  %v1327_v41 = vsel %vm1326_vm14, %v1744_v33, %v1323_v58  ;;  %v1341_v53 = vsub.f32 1.0, %v1340_v44 }
 0x4fa   :  { %v1332_v1 = vsel %vm1329_vm0, %v1331_v40, %v1327_v41  ;;  %v1355_v59 = vmul.f32 %v1748_v36, %v1313_v47 }
 0x4fb   :  { %v1354_v60 = vmul.f32 %v1332_v1, %v2947_v7  ;;  %v1342_v62 = vmul.f32 %v1746_v39, %v1341_v53  ;;  %v1517_v7 = vld [vmem:[#allocation7 + $0x78] sm:$0xff] }
 0x4fc   :  { %1522 = vmatpush.msrb.mxu0 %v1517_v7 }
 0x4fd   :  { %v2955_v3 = vadd.f32 %v1355_v59, %v1354_v60  ;;  %v1343_v10 = vadd.f32 %v1746_v39, %v1342_v62 }
 0x4fe   :  { %1523 = vmatpush.msrb.mxu0 %v1516_v35 }
 0x4ff   :  { %1749 = vtanh.f32 %v2955_v3  ;;  %v1347_v48 = vsel %vm1346_vm3, %v1746_v39, %v1343_v10 }
 0x500   :  { %v1352_v12 = vsel %vm1349_vm4, %v1351_v13, %v1347_v48  ;;  %1524 = vmatpush.msrb.mxu0 %v1515_v14 }
 0x502   :  { %1525 = vmatpush.msrb.mxu0 %v1514_v18 }
 0x504   :  { %1526 = vmatpush.msrb.mxu0 %v1513_v57 }
 0x505   :  { %v1750_v8 = vpop.eup %1749 }
 0x506   :  { %v1358_v20 = vmul.f32 %v1750_v8, %v1352_v12  ;;  %1527 = vmatpush.msrb.mxu0 %v1512_v0 }
 0x508   :  { %1375 = vmatmul.f32.vlgmr.msra.gmra.mxu0 %v1358_v20  ;;  %1395 = vmatmul.f32.vlgmr.msrb.gmra.mxu1 %v1358_v20 }
 0x509   :  { %1415 = vmatmul.f32.vlgmr.msrb.gmra.mxu2 %v1358_v20  ;;  %1435 = vmatmul.f32.vlgmr.msrb.gmra.mxu3 %v1358_v20 }
 0x50a   :  { %1528 = vmatpush.msrb.mxu0 %v1511_v9 }
 0x50c   :  { %1529 = vmatpush.msrb.mxu0 %v1510_v46 }
 0x50e   :  { %1530 = vmatpush.msrb.mxu0 %v1509_v63 }
 0x510   :  { %1531 = vmatpush.msrb.mxu0 %v1508_v21 }
 0x512   :  { %1532 = vmatpush.msrb.mxu0 %v1507_v2 }
 0x514   :  { %1533 = vmatpush.msrb.mxu0 %v1506_v24 }
 0x516   :  { %1534 = vmatpush.msrb.mxu0 %v1505_v25 }
 0x518   :  { %1535 = vmatpush.msrb.mxu0 %v1504_v27 }
 0x51a   :  { %1536 = vmatpush.msrb.mxu0 %v1503_v29 }
 0x51c   :  { %1537 = vmatpush.msrb.mxu0 %v1502_v49 }
 0x585   :  { %v1376_v17 = vpop.f32.mrf.mxu0  ;;  %v1396_v23 = vpop.f32.mrf.mxu1 }
 0x586   :  { %v1377_v61 = vadd.f32 %v1376_v17, %v3275_v11  ;;  %v1397_v4 = vadd.f32 %v1396_v23, %v3276_v6 }
 0x588   :  { %v1614_v16 = vmul.f32 -1.442695, %v1377_v61  ;;  %v1615_v19 = vmul.f32 -1.442695, %v1397_v4 }
 0x58a   :  { %1751 = vpow2.f32 %v1614_v16 }
 0x58b   :  { %1753 = vpow2.f32 %v1615_v19 }
 0x58c   :  { %v1436_v28 = vpop.f32.mrf.mxu3  ;;  %v1416_v54 = vpop.f32.mrf.mxu2 }
 0x58d   :  { %v1437_v32 = vadd.f32 %v1436_v28, %v3277_v31  ;;  %v1417_v43 = vadd.f32 %v1416_v54, %v3278_v34 }
 0x58f   :  { %v1616_v26 = vmul.f32 -1.442695, %v1437_v32 }
 0x590   :  { %v1752_v45 = vpop.eup %1751 }
 0x591   :  { %v1754_v33 = vpop.eup %1753  ;;  %v1442_v37 = vadd.f32 1.0, %v1752_v45  ;;  %1755 = vpow2.f32 %v1616_v26 }
 0x592   :  { %v1461_v15 = vadd.f32 1.0, %v1754_v33 }
 0x593   :  { %1757 = vrcp.f32 %v1442_v37  ;;  %v1454_v58 = vand.u32 2147483648, %v1442_v37  ;;  %v1452_v42 = vand.u32 2147483647, %v1442_v37  ;;  %vm1448_vm7 = vweird.f32 %v1442_v37 }
 0x594   :  { %1759 = vrcp.f32 %v1461_v15  ;;  %v1473_v44 = vand.u32 2147483648, %v1461_v15  ;;  %v1471_v47 = vand.u32 2147483647, %v1461_v15  ;;  %vm1467_vm8 = vweird.f32 %v1461_v15 }
 0x595   :  { %v1455_v1 = vor.u32 1.1754944e-38, %v1454_v58  ;;  %vm1453_vm11 = vcmp.eq.f32.partialorder %v1452_v42, 8.507059e+37 }
 0x596   :  { %v1474_v62 = vor.u32 1.1754944e-38, %v1473_v44  ;;  %vm1472_vm12 = vcmp.eq.f32.partialorder %v1471_v47, 8.507059e+37 }
 0x597   :  { %v1756_v50 = vpop.eup %1755 }
 0x598   :  { %v1481_v55 = vadd.f32 1.0, %v1756_v50 }
 0x599   :  { %v1758_v52 = vpop.eup %1757 }
 0x59a   :  { %v1760_v56 = vpop.eup %1759  ;;  %v1444_v38 = vmul.f32 %v1758_v52, %v1442_v37  ;;  %1761 = vrcp.f32 %v1481_v55  ;;  %vm1449_vm5 = vweird.f32 %v1758_v52  ;;  %v1493_v18 = vand.u32 2147483648, %v1481_v55 }
 0x59b   :  { %v1463_v39 = vmul.f32 %v1760_v56, %v1461_v15  ;;  %1763 = vtanh.f32 %v1417_v43  ;;  %vm1468_vm6 = vweird.f32 %v1760_v56  ;;  %vm1450_vm9 = vmor %vm1448_vm7, %vm1449_vm5  ;;  %vm1487_vm14 = vweird.f32 %v1481_v55 }
 0x59c   :  { %v1445_v51 = vsub.f32 1.0, %v1444_v38  ;;  %vm1469_vm10 = vmor %vm1467_vm8, %vm1468_vm6  ;;  %v1491_v57 = vand.u32 2147483647, %v1481_v55  ;;  %v1494_v9 = vor.u32 1.1754944e-38, %v1493_v18 }
 0x59d   :  { %v1464_v30 = vsub.f32 1.0, %v1463_v39 }
 0x59e   :  { %v1446_v40 = vmul.f32 %v1758_v52, %v1445_v51  ;;  %vm1492_vm0 = vcmp.eq.f32.partialorder %v1491_v57, 8.507059e+37 }
 0x59f   :  { %v1465_v36 = vmul.f32 %v1760_v56, %v1464_v30 }
 0x5a0   :  { %v1762_v41 = vpop.eup %1761  ;;  %v1447_v53 = vadd.f32 %v1758_v52, %v1446_v40 }
 0x5a1   :  { %v1466_v59 = vadd.f32 %v1760_v56, %v1465_v36  ;;  %v1483_v60 = vmul.f32 %v1762_v41, %v1481_v55  ;;  %v1764_v5 = vpop.eup %1763  ;;  %vm1488_vm13 = vweird.f32 %v1762_v41 }
 0x5a2   :  { %v1451_v10 = vsel %vm1450_vm9, %v1758_v52, %v1447_v53  ;;  %vm1489_vm15 = vmor %vm1487_vm14, %vm1488_vm13 }
 0x5a3   :  { %v1456_v22 = vsel %vm1453_vm11, %v1455_v1, %v1451_v10  ;;  %v1470_v48 = vsel %vm1469_vm10, %v1760_v56, %v1466_v59  ;;  %v1484_v13 = vsub.f32 1.0, %v1483_v60 }
 0x5a4   :  { %v1475_v8 = vsel %vm1472_vm12, %v1474_v62, %v1470_v48  ;;  %v1498_v12 = vmul.f32 %v1764_v5, %v1456_v22 }
 0x5a5   :  { %v1497_v20 = vmul.f32 %v1475_v8, %v2955_v3  ;;  %v1485_v7 = vmul.f32 %v1762_v41, %v1484_v13  ;;  %v1638_v3 = vld [vmem:[%s2974_s5] ss:$0 sm:$0xff] }
 0x5a7   :  { %v1499_v35 = vadd.f32 %v1498_v12, %v1497_v20  ;;  %v1486_v14 = vadd.f32 %v1762_v41, %v1485_v7 }
 0x5a9   :  { %1765 = vtanh.f32 %v1499_v35  ;;  %v1490_v0 = vsel %vm1489_vm15, %v1762_v41, %v1486_v14 }
 0x5aa   :  { %v1495_v63 = vsel %vm1492_vm0, %v1494_v9, %v1490_v0 }
 0x5af   :  { %v1766_v46 = vpop.eup %1765 }
 0x5b0   :  { %v1501_v21 = vmul.f32 %v1766_v46, %v1495_v63 }
 0x5b2   :  { %1538 = vmatmul.f32.vlgmr.msrb.gmra.mxu0 %v1501_v21 }
 0x62f   :  { %v1539_v17 = vpop.f32.mrf.mxu0 }
 0x630   :  { %v1540_v23 = vadd.f32 %v1638_v3, %v1539_v17 }
 0x632   :  { %1542 = vst [vmem:[#allocation8] sm:$0xff] %v1540_v23 }
 0x633   :  { %1553 = dma.vmem_to_hbm [thread:$0]  %s1549_s8, 128, %s1551_s11, [#allocation4]  }
 0x634   :  { %1931 = dma.done.wait [#allocation4], 128  }
 0x635   :  { %1932 = vsyncadd [#allocation4], 4294967168 }
 0x636   :  { %1558 = vsyncpa [#allocation3], 1 }
 0x637   :  { %1559 = vsyncpa [#allocation6], 1 }
 0x638   :  { %1560 = vsyncpa [#allocation4], 1 }

</bundles_post_ra>
